<compile_context>
chip_gen: v7x
topology: tpu7x:2x2x1
jax: 0.10.0
libtpu: 0.0.40
codegen_flags: <defaults>
</compile_context>

<pallas_src>
import functools
import math

import jax
import jax.numpy as jnp
import numpy as np
from jax.experimental import pallas as pl
from jax.experimental.pallas import tpu as pltpu

_HIST = 8  # sublane-aligned history rows carried for the causal conv (>= K-1)


def _silu(v):
    # exact sigmoid via tanh: 1 EUP op/element (vs exp + reciprocal).
    return 0.5 * v * (1.0 + jnp.tanh(0.5 * v))


def _softplus(v):
    # numerically stable softplus (matches F.softplus with threshold=20)
    safe = jnp.minimum(v, 20.0)
    return jnp.where(v > 20.0, v, jnp.log(1.0 + jnp.exp(safe)))


def _residual_kernel(x_ref, rms_ref, winx_ref, winr_ref, convw_ref, convb_ref,
                     wxp_ref, wdt_ref, bdt_ref, a_ref, eye2_ref, dvec_ref,
                     wout_ref, out_ref,
                     st_scr, hist_scr, dt_scr, bc_scr,
                     *, TL, d, d_inner, n, dt_rank, K):
    eps = 1e-5
    CH = 8  # scan chunk: one aligned (8, x) load/store per 8 steps
    j = pl.program_id(1)

    # st_scr / hist_scr carry state across sequence tiles of one batch row.
    # This is correct ONLY because grid axis 1 (sequence) is innermost and
    # iterated sequentially ("arbitrary"); never mark it "parallel" or reorder
    # the grid axes.
    @pl.when(j == 0)
    def _init():
        st_scr[...] = jnp.zeros((n, d_inner), jnp.float32)
        hist_scr[pl.ds(0, _HIST), :] = jnp.zeros((_HIST, d_inner), jnp.float32)

    x = x_ref[0]                                                     # (TL, d) f32

    # ---- RMSNorm (f32) -> bf16 for the MXU ----
    ms = jnp.mean(x * x, axis=-1, keepdims=True)
    xn = (x * jax.lax.rsqrt(ms + eps) * rms_ref[...]).astype(jnp.bfloat16)

    # ---- in_proj: x-branch and res-branch (bf16 MXU, f32 accumulation) ----
    xs = jnp.dot(xn, winx_ref[...], preferred_element_type=jnp.float32)    # (TL, d_inner)
    res = jnp.dot(xn, winr_ref[...], preferred_element_type=jnp.float32)   # (TL, d_inner)

    # ---- causal depthwise conv1d (kernel K, left-pad K-1, truncated to l) ----
    hist_scr[pl.ds(_HIST, TL), :] = xs
    convw = convw_ref[...]                                           # (K, d_inner)
    conv = convb_ref[...] + convw[K - 1:K, :] * xs                   # newest tap, in registers
    for k in range(K - 1):                                           # older taps from history
        conv = conv + convw[k:k + 1, :] * hist_scr[pl.ds(_HIST - (K - 1) + k, TL), :]
    xc = _silu(conv)                                                 # (TL, d_inner) f32

    # Carry this tile's xs tail for the next tile, then reuse the xs rows to
    # hold xc (saves one (TL, d_inner) VMEM buffer; xc is re-read below).
    hist_scr[pl.ds(0, _HIST), :] = hist_scr[pl.ds(TL, _HIST), :]
    hist_scr[pl.ds(_HIST, TL), :] = xc

    # ---- fused x_proj, packed [B | C | delta], lane-padded output, + dt_proj ----
    dbc = jnp.dot(xc.astype(jnp.bfloat16), wxp_ref[...],
                  preferred_element_type=jnp.float32)                # (TL, PW)
    bc_scr[...] = dbc[:, :2 * n]                                     # lane-aligned B|C slab
    delta_r = dbc[:, 2 * n:2 * n + dt_rank].astype(wdt_ref.dtype)
    dt_scr[...] = _softplus(
        jnp.dot(delta_r, wdt_ref[...], preferred_element_type=jnp.float32)
        + bdt_ref[...])                                              # (TL, d_inner)

    # ---- selective scan: carry is (n, d_inner) with d_inner on lanes ----
    A = a_ref[...]                                                   # -exp(A_log)^T, (n, d_inner)
    eye2 = eye2_ref[...]                                             # (2n, 2n)

    def chunk(c, st):
        off = pl.multiple_of(c * CH, CH)
        xoff = pl.multiple_of(c * CH + _HIST, CH)
        dt_blk = dt_scr[pl.ds(off, CH), :]                           # (8, d_inner)
        du_blk = dt_blk * hist_scr[pl.ds(xoff, CH), :]               # delta * u
        bc_blk = bc_scr[pl.ds(off, CH), :]                           # (8, 2n)
        # (8, 2n) -> (2n, 8): tiny MXU transpose (identity @ bc_blk^T); the MXU
        # is otherwise idle during the scan, so this is effectively free.
        bct = jax.lax.dot_general(eye2, bc_blk, (((1,), (1,)), ((), ())),
                                  preferred_element_type=jnp.float32)
        ys = []
        for i in range(CH):                                          # static unroll (LLO)
            dA = jnp.exp(dt_blk[i:i + 1, :] * A)                     # (n, d_inner)
            st = dA * st + bct[0:n, i:i + 1] * du_blk[i:i + 1, :]
            ys.append(jnp.sum(st * bct[n:2 * n, i:i + 1], axis=0, keepdims=True))
        dt_scr[pl.ds(off, CH), :] = jnp.concatenate(ys, axis=0)      # y over dead dt rows
        return st

    st_fin = jax.lax.fori_loop(0, TL // CH, chunk, st_scr[...])
    st_scr[...] = st_fin                                             # carry across tiles

    # ---- y = scan + u*D, gate with silu(res), out_proj (bf16), residual add ----
    y = (dt_scr[...] + hist_scr[pl.ds(_HIST, TL), :] * dvec_ref[...]) * _silu(res)
    out = jnp.dot(y.astype(jnp.bfloat16), wout_ref[...],
                  preferred_element_type=jnp.float32)                # (TL, d)
    # re-read x: avoids keeping a (TL, d) value live across the whole scan
    out_ref[0] = out + x_ref[0]


def residual_block_pallas(x, p, *, seq_tile=None):
    b, l, d = x.shape
    d_inner = p["W_in_x"].shape[1]
    n = p["A_nd"].shape[0]
    dt_rank = p["W_dt"].shape[0]
    K = p["conv_w"].shape[0]
    assert K - 1 <= _HIST

    if seq_tile is None:
        # 256 keeps the f32 scratch + bf16 weights inside v7x's 64 MiB VMEM;
        # on v6e/v5e (128 MiB physical) callers can pass 512/1024.
        seq_tile = min(l, 256)
    TL = int(seq_tile)
    if l % TL != 0 or TL % 8 != 0 or TL < _HIST:
        raise ValueError("sequence length must split into 8-aligned tiles >= 8")
    nl = l // TL

    bf16 = jnp.bfloat16
    # x_proj weight packed [B | C | delta] and lane-padded to a multiple of 128:
    # unmasked MXU output tile, and the B|C slab starts at lane 0 (aligned slice).
    pw = ((2 * n + dt_rank + 127) // 128) * 128
    wxp = jnp.zeros((d_inner, pw), jnp.float32)
    wxp = wxp.at[:, :2 * n].set(p["W_x_bc"])
    wxp = wxp.at[:, 2 * n:2 * n + dt_rank].set(p["W_x_delta"])
    # dt_proj's contraction is dt_rank (can be 1); keep it f32 when tiny.
    wdt = p["W_dt"].astype(bf16) if dt_rank >= 8 else p["W_dt"]
    eye2 = jnp.eye(2 * n, dtype=jnp.float32)   # transpose helper for the scan

    weights = [p["rms_w"],
               p["W_in_x"].astype(bf16), p["W_in_res"].astype(bf16),
               p["conv_w"], p["conv_b"],
               wxp.astype(bf16), wdt, p["b_dt"],
               p["A_nd"], eye2, p["D"],
               p["W_out"].astype(bf16)]

    def full_spec(arr):
        nd = arr.ndim
        return pl.BlockSpec(arr.shape, lambda i, j, _nd=nd: (0,) * _nd)

    # VMEM budget computed from actual buffer sizes (weights x2 for the pipeline
    # double buffer, IO blocks x2, f32 scratch) with headroom; clamped to 64 MiB
    # so it is valid on every generation (v7x has 64 MiB per TensorCore).
    def _lanes(c):
        return max(128, ((int(c) + 127) // 128) * 128)
    weight_bytes = sum(int(w.size) * w.dtype.itemsize for w in weights)
    io_bytes = 2 * (2 * TL * _lanes(d) * 4)
    scratch_bytes = 4 * ((n + (TL + _HIST) + TL) * _lanes(d_inner) + TL * _lanes(2 * n))
    est = 2 * weight_bytes + io_bytes + scratch_bytes
    vmem_limit = int(min(64 * 1024 * 1024, max(16 * 1024 * 1024, 1.5 * est)))

    kernel = functools.partial(_residual_kernel, TL=TL, d=d, d_inner=d_inner,
                               n=n, dt_rank=dt_rank, K=K)

    return pl.pallas_call(
        kernel,
        out_shape=jax.ShapeDtypeStruct((b, l, d), jnp.float32),
        grid_spec=pltpu.PrefetchScalarGridSpec(
            num_scalar_prefetch=0,
            # Axis 1 (sequence) MUST stay innermost + "arbitrary": scratch carries
            # the scan state / conv tail across sequence tiles.
            grid=(b, nl),
            in_specs=[pl.BlockSpec((1, TL, d), lambda i, j: (i, j, 0))]
                     + [full_spec(w) for w in weights],
            out_specs=pl.BlockSpec((1, TL, d), lambda i, j: (i, j, 0)),
            scratch_shapes=[
                pltpu.VMEM((n, d_inner), jnp.float32),             # carried scan state
                pltpu.VMEM((TL + _HIST, d_inner), jnp.float32),    # conv history, xs then xc
                pltpu.VMEM((TL, d_inner), jnp.float32),            # dt, reused for y
                pltpu.VMEM((TL, 2 * n), jnp.float32),              # merged B|C rows
            ],
        ),
        compiler_params=pltpu.CompilerParams(
            dimension_semantics=("parallel", "arbitrary"),
            vmem_limit_bytes=vmem_limit),
    )(x, *weights)


def init_params(key, d_model, d_state=16, expand=2, d_conv=4):
    """Deterministic synthetic parameters with the PyTorch module's shapes,
    repacked into the kernel layout (transposes / A precompute — pure glue)."""
    d_inner = int(expand * d_model)
    dt_rank = math.ceil(d_model / 16)
    ks = jax.random.split(key, 7)
    s = 0.1
    # PyTorch-native shapes
    W_in = jax.random.normal(ks[0], (2 * d_inner, d_model), jnp.float32) * s          # in_proj.weight
    conv_w = jax.random.normal(ks[1], (d_inner, 1, d_conv), jnp.float32) * s          # conv1d.weight
    conv_b = jax.random.normal(ks[2], (d_inner,), jnp.float32) * s                    # conv1d.bias
    W_xp = jax.random.normal(ks[3], (dt_rank + 2 * d_state, d_inner), jnp.float32) * s  # x_proj.weight
    W_dt = jax.random.normal(ks[4], (d_inner, dt_rank), jnp.float32) * s              # dt_proj.weight
    b_dt = jax.random.normal(ks[5], (d_inner,), jnp.float32) * s                      # dt_proj.bias
    A_log = jnp.log(jnp.tile(jnp.arange(1, d_state + 1, dtype=jnp.float32)[None, :],
                             (d_inner, 1)))                                           # (d_inner, n)
    D = jnp.ones((d_inner,), jnp.float32)
    W_out = jax.random.normal(ks[6], (d_model, d_inner), jnp.float32) * s             # out_proj.weight
    rms_w = jnp.ones((d_model,), jnp.float32)                                         # RMSNorm.weight

    return dict(
        rms_w=rms_w.reshape(1, d_model),
        W_in_x=W_in[:d_inner].T,                  # (d_model, d_inner)
        W_in_res=W_in[d_inner:].T,                # (d_model, d_inner)
        conv_w=conv_w[:, 0, :].T,                 # (d_conv, d_inner)
        conv_b=conv_b.reshape(1, d_inner),
        W_x_delta=W_xp[:dt_rank].T,               # (d_inner, dt_rank)
        W_x_bc=W_xp[dt_rank:].T,                  # (d_inner, 2n)  B then C
        W_dt=W_dt.T,                              # (dt_rank, d_inner)
        b_dt=b_dt.reshape(1, d_inner),
        A_nd=(-jnp.exp(A_log)).T,                 # (n, d_inner)   precomputed -exp(A_log)
        D=D.reshape(1, d_inner),
        W_out=W_out.T,                            # (d_inner, d_model)
    )


def residual_block_ref(x, p):
    """Pure-JAX f32 reference mirroring the PyTorch forward pass."""
    eps = 1e-5
    b, l, d = x.shape
    xn = x * jax.lax.rsqrt(jnp.mean(x * x, -1, keepdims=True) + eps) * p["rms_w"][0]
    xs = xn @ p["W_in_x"]
    res = xn @ p["W_in_res"]
    K = p["conv_w"].shape[0]
    d_inner = xs.shape[-1]
    xp = jnp.concatenate([jnp.zeros((b, K - 1, d_inner), jnp.float32), xs], axis=1)
    conv = jnp.zeros_like(xs)
    for k in range(K):
        conv = conv + p["conv_w"][k][None, None, :] * xp[:, k:k + l, :]
    conv = conv + p["conv_b"][0]
    xc = conv * jax.nn.sigmoid(conv)
    n = p["A_nd"].shape[0]
    bc = xc @ p["W_x_bc"]
    Bm, Cm = bc[..., :n], bc[..., n:]
    dt = jax.nn.softplus(xc @ p["W_x_delta"] @ p["W_dt"] + p["b_dt"][0])
    A = p["A_nd"].T                               # (d_inner, n)
    dA = jnp.exp(dt[..., None] * A)
    dBu = dt[..., None] * Bm[:, :, None, :] * xc[..., None]
    st = jnp.zeros((b, d_inner, n), jnp.float32)
    ys = []
    for i in range(l):
        st = dA[:, i] * st + dBu[:, i]
        ys.append(jnp.einsum("bdn,bn->bd", st, Cm[:, i]))
    y = jnp.stack(ys, axis=1) + xc * p["D"][0]
    y = y * (res * jax.nn.sigmoid(res))
    return y @ p["W_out"] + x


if __name__ == "__main__":
    d_model = 16          # -> d_inner = 32, dt_rank = 1, d_state = 16, d_conv = 4
    b, l = 2, 16
    key = jax.random.PRNGKey(0)
    kx, kp = jax.random.split(key)
    x = jax.random.normal(kx, (b, l, d_model), jnp.float32)
    params = init_params(kp, d_model)

    # seq_tile=8 -> grid=(2, 2): exercises the carried scan-state / conv-tail path.
    out = residual_block_pallas(x, params, seq_tile=8)
    out = jax.block_until_ready(out)

    ref = residual_block_ref(x, params)
    assert out.shape == x.shape
    np.testing.assert_allclose(np.asarray(out), np.asarray(ref), atol=2e-2, rtol=2e-2)
    print("KERNEL_OK")
</pallas_src>

<mosaic_0001>
module attributes {stable_mosaic.version = 11 : i64} {
  func.func @_residual_kernel(%arg0: i32, %arg1: i32, %arg2: memref<1x8x16xf32, #tpu.memory_space<vmem>>, %arg3: memref<1x16xf32, #tpu.memory_space<vmem>>, %arg4: memref<16x32xbf16, #tpu.memory_space<vmem>>, %arg5: memref<16x32xbf16, #tpu.memory_space<vmem>>, %arg6: memref<4x32xf32, #tpu.memory_space<vmem>>, %arg7: memref<1x32xf32, #tpu.memory_space<vmem>>, %arg8: memref<32x128xbf16, #tpu.memory_space<vmem>>, %arg9: memref<1x32xf32, #tpu.memory_space<vmem>>, %arg10: memref<1x32xf32, #tpu.memory_space<vmem>>, %arg11: memref<16x32xf32, #tpu.memory_space<vmem>>, %arg12: memref<32x32xf32, #tpu.memory_space<vmem>>, %arg13: memref<1x32xf32, #tpu.memory_space<vmem>>, %arg14: memref<32x16xbf16, #tpu.memory_space<vmem>>, %arg15: memref<1x8x16xf32, #tpu.memory_space<vmem>>, %arg16: memref<16x32xf32, #tpu.memory_space<vmem>>, %arg17: memref<16x32xf32, #tpu.memory_space<vmem>>, %arg18: memref<8x32xf32, #tpu.memory_space<vmem>>, %arg19: memref<8x32xf32, #tpu.memory_space<vmem>>) attributes {dimension_semantics = [#tpu.dimension_semantics<parallel>, #tpu.dimension_semantics<arbitrary>], iteration_bounds = array<i64: 2, 2>, scalar_prefetch = 0 : i64, scratch_operands = 4 : i64, tpu.core_type = #tpu.core_type<tc>, window_params = [{transform_indices = @transform_0, window_bounds = array<i64: 1, 8, 16>}, {pipeline_mode = #tpu.pipeline_mode<synchronous>, transform_indices = @transform_1, window_bounds = array<i64: 1, 16>}, {pipeline_mode = #tpu.pipeline_mode<synchronous>, transform_indices = @transform_2, window_bounds = array<i64: 16, 32>}, {pipeline_mode = #tpu.pipeline_mode<synchronous>, transform_indices = @transform_3, window_bounds = array<i64: 16, 32>}, {pipeline_mode = #tpu.pipeline_mode<synchronous>, transform_indices = @transform_4, window_bounds = array<i64: 4, 32>}, {pipeline_mode = #tpu.pipeline_mode<synchronous>, transform_indices = @transform_5, window_bounds = array<i64: 1, 32>}, {pipeline_mode = #tpu.pipeline_mode<synchronous>, transform_indices = @transform_6, window_bounds = array<i64: 32, 128>}, {pipeline_mode = #tpu.pipeline_mode<synchronous>, transform_indices = @transform_7, window_bounds = array<i64: 1, 32>}, {pipeline_mode = #tpu.pipeline_mode<synchronous>, transform_indices = @transform_8, window_bounds = array<i64: 1, 32>}, {pipeline_mode = #tpu.pipeline_mode<synchronous>, transform_indices = @transform_9, window_bounds = array<i64: 16, 32>}, {pipeline_mode = #tpu.pipeline_mode<synchronous>, transform_indices = @transform_10, window_bounds = array<i64: 32, 32>}, {pipeline_mode = #tpu.pipeline_mode<synchronous>, transform_indices = @transform_11, window_bounds = array<i64: 1, 32>}, {pipeline_mode = #tpu.pipeline_mode<synchronous>, transform_indices = @transform_12, window_bounds = array<i64: 32, 16>}, {transform_indices = @transform_13, window_bounds = array<i64: 1, 8, 16>}]} {
    %c0_i32 = arith.constant 0 : i32
    %0 = arith.cmpi eq, %arg1, %c0_i32 : i32
    %1 = arith.extui %0 : i1 to i32
    %c0_i32_0 = arith.constant 0 : i32
    %2 = arith.cmpi ne, %1, %c0_i32_0 : i32
    scf.if %2 {
      %cst_87 = arith.constant 0.000000e+00 : f32
      %250 = vector.broadcast %cst_87 : f32 to vector<16x32xf32>
      %c0_88 = arith.constant 0 : index
      %c0_89 = arith.constant 0 : index
      %251 = vector.load %arg16[%c0_88, %c0_89] : memref<16x32xf32, #tpu.memory_space<vmem>>, vector<16x32xf32>
      tpu.vector_store %arg16[%c0_88, %c0_89], %250 {strides = array<i32>} : memref<16x32xf32, #tpu.memory_space<vmem>>, vector<16x32xf32>,
      %cst_90 = arith.constant 0.000000e+00 : f32
      %252 = vector.broadcast %cst_90 : f32 to vector<8x32xf32>
      %c0_91 = arith.constant 0 : index
      %c0_92 = arith.constant 0 : index
      %253 = vector.load %arg17[%c0_91, %c0_92] : memref<16x32xf32, #tpu.memory_space<vmem>>, vector<8x32xf32>
      tpu.vector_store %arg17[%c0_91, %c0_92], %252 {strides = array<i32>} : memref<16x32xf32, #tpu.memory_space<vmem>>, vector<8x32xf32>,
    } else {
    }
    %c0 = arith.constant 0 : index
    %c0_1 = arith.constant 0 : index
    %c0_2 = arith.constant 0 : index
    %3 = vector.load %arg2[%c0, %c0_1, %c0_2] : memref<1x8x16xf32, #tpu.memory_space<vmem>>, vector<1x8x16xf32>
    %4 = vector.shape_cast %3 : vector<1x8x16xf32> to vector<8x16xf32>
    %5 = arith.mulf %4, %4 : vector<8x16xf32>
    %cst = arith.constant dense<0.000000e+00> : vector<8xf32>
    %6 = vector.multi_reduction <add>, %5, %cst [1] : vector<8x16xf32> to vector<8xf32>
    %7 = vector.shape_cast %6 : vector<8xf32> to vector<8x1xf32>
    %cst_3 = arith.constant 1.600000e+01 : f32
    %8 = vector.broadcast %cst_3 : f32 to vector<8x1xf32>
    %9 = arith.divf %7, %8 : vector<8x1xf32>
    %cst_4 = arith.constant 9.99999974E-6 : f32
    %10 = vector.broadcast %cst_4 : f32 to vector<8x1xf32>
    %11 = arith.addf %9, %10 : vector<8x1xf32>
    %12 = math.rsqrt %11 : vector<8x1xf32>
    %13 = vector.broadcast %12 : vector<8x1xf32> to vector<8x16xf32>
    %14 = arith.mulf %4, %13 : vector<8x16xf32>
    %c0_5 = arith.constant 0 : index
    %c0_6 = arith.constant 0 : index
    %15 = vector.load %arg3[%c0_5, %c0_6] : memref<1x16xf32, #tpu.memory_space<vmem>>, vector<1x16xf32>
    %16 = vector.broadcast %15 : vector<1x16xf32> to vector<8x16xf32>
    %17 = arith.mulf %14, %16 : vector<8x16xf32>
    %18 = arith.truncf %17 : vector<8x16xf32> to vector<8x16xbf16>
    %c0_7 = arith.constant 0 : index
    %c0_8 = arith.constant 0 : index
    %19 = vector.load %arg4[%c0_7, %c0_8] : memref<16x32xbf16, #tpu.memory_space<vmem>>, vector<16x32xbf16>
    %cst_9 = arith.constant dense<0.000000e+00> : vector<8x32xf32>
    %20 = tpu.matmul %18, %19, %cst_9 {dimension_numbers = #tpu.dot_dimension_numbers<[1], [0], [0], [1], [0, 0, 1, 1], [], []>} : vector<8x16xbf16>, vector<16x32xbf16>, vector<8x32xf32> -> vector<8x32xf32>
    %c0_10 = arith.constant 0 : index
    %c0_11 = arith.constant 0 : index
    %21 = vector.load %arg5[%c0_10, %c0_11] : memref<16x32xbf16, #tpu.memory_space<vmem>>, vector<16x32xbf16>
    %cst_12 = arith.constant dense<0.000000e+00> : vector<8x32xf32>
    %22 = tpu.matmul %18, %21, %cst_12 {dimension_numbers = #tpu.dot_dimension_numbers<[1], [0], [0], [1], [0, 0, 1, 1], [], []>} : vector<8x16xbf16>, vector<16x32xbf16>, vector<8x32xf32> -> vector<8x32xf32>
    %c8 = arith.constant 8 : index
    %c0_13 = arith.constant 0 : index
    %23 = vector.load %arg17[%c8, %c0_13] : memref<16x32xf32, #tpu.memory_space<vmem>>, vector<8x32xf32>
    tpu.vector_store %arg17[%c8, %c0_13], %20 {strides = array<i32>} : memref<16x32xf32, #tpu.memory_space<vmem>>, vector<8x32xf32>,
    %c0_14 = arith.constant 0 : index
    %c0_15 = arith.constant 0 : index
    %24 = vector.load %arg6[%c0_14, %c0_15] : memref<4x32xf32, #tpu.memory_space<vmem>>, vector<4x32xf32>
    %c0_16 = arith.constant 0 : index
    %c0_17 = arith.constant 0 : index
    %25 = vector.load %arg7[%c0_16, %c0_17] : memref<1x32xf32, #tpu.memory_space<vmem>>, vector<1x32xf32>
    %26 = vector.extract_strided_slice %24 {offsets = [3, 0], sizes = [1, 32], strides = [1, 1]} : vector<4x32xf32> to vector<1x32xf32>
    %27 = vector.broadcast %26 : vector<1x32xf32> to vector<8x32xf32>
    %28 = arith.mulf %27, %20 : vector<8x32xf32>
    %29 = vector.broadcast %25 : vector<1x32xf32> to vector<8x32xf32>
    %30 = arith.addf %29, %28 : vector<8x32xf32>
    %31 = vector.extract_strided_slice %24 {offsets = [0, 0], sizes = [1, 32], strides = [1, 1]} : vector<4x32xf32> to vector<1x32xf32>
    %c5 = arith.constant 5 : index
    %c0_18 = arith.constant 0 : index
    %32 = vector.load %arg17[%c5, %c0_18] : memref<16x32xf32, #tpu.memory_space<vmem>>, vector<8x32xf32>
    %33 = vector.broadcast %31 : vector<1x32xf32> to vector<8x32xf32>
    %34 = arith.mulf %33, %32 : vector<8x32xf32>
    %35 = arith.addf %30, %34 : vector<8x32xf32>
    %36 = vector.extract_strided_slice %24 {offsets = [1, 0], sizes = [1, 32], strides = [1, 1]} : vector<4x32xf32> to vector<1x32xf32>
    %c6 = arith.constant 6 : index
    %c0_19 = arith.constant 0 : index
    %37 = vector.load %arg17[%c6, %c0_19] : memref<16x32xf32, #tpu.memory_space<vmem>>, vector<8x32xf32>
    %38 = vector.broadcast %36 : vector<1x32xf32> to vector<8x32xf32>
    %39 = arith.mulf %38, %37 : vector<8x32xf32>
    %40 = arith.addf %35, %39 : vector<8x32xf32>
    %41 = vector.extract_strided_slice %24 {offsets = [2, 0], sizes = [1, 32], strides = [1, 1]} : vector<4x32xf32> to vector<1x32xf32>
    %c7 = arith.constant 7 : index
    %c0_20 = arith.constant 0 : index
    %42 = vector.load %arg17[%c7, %c0_20] : memref<16x32xf32, #tpu.memory_space<vmem>>, vector<8x32xf32>
    %43 = vector.broadcast %41 : vector<1x32xf32> to vector<8x32xf32>
    %44 = arith.mulf %43, %42 : vector<8x32xf32>
    %45 = arith.addf %40, %44 : vector<8x32xf32>
    %cst_21 = arith.constant 5.000000e-01 : f32
    %46 = vector.broadcast %cst_21 : f32 to vector<8x32xf32>
    %47 = arith.mulf %46, %45 : vector<8x32xf32>
    %cst_22 = arith.constant 5.000000e-01 : f32
    %48 = vector.broadcast %cst_22 : f32 to vector<8x32xf32>
    %49 = arith.mulf %48, %45 : vector<8x32xf32>
    %50 = math.tanh %49 : vector<8x32xf32>
    %cst_23 = arith.constant 1.000000e+00 : f32
    %51 = vector.broadcast %cst_23 : f32 to vector<8x32xf32>
    %52 = arith.addf %51, %50 : vector<8x32xf32>
    %53 = arith.mulf %47, %52 : vector<8x32xf32>
    %c8_24 = arith.constant 8 : index
    %c0_25 = arith.constant 0 : index
    %54 = vector.load %arg17[%c8_24, %c0_25] : memref<16x32xf32, #tpu.memory_space<vmem>>, vector<8x32xf32>
    %c0_26 = arith.constant 0 : index
    %c0_27 = arith.constant 0 : index
    %55 = vector.load %arg17[%c0_26, %c0_27] : memref<16x32xf32, #tpu.memory_space<vmem>>, vector<8x32xf32>
    tpu.vector_store %arg17[%c0_26, %c0_27], %54 {strides = array<i32>} : memref<16x32xf32, #tpu.memory_space<vmem>>, vector<8x32xf32>,
    %c8_28 = arith.constant 8 : index
    %c0_29 = arith.constant 0 : index
    %56 = vector.load %arg17[%c8_28, %c0_29] : memref<16x32xf32, #tpu.memory_space<vmem>>, vector<8x32xf32>
    tpu.vector_store %arg17[%c8_28, %c0_29], %53 {strides = array<i32>} : memref<16x32xf32, #tpu.memory_space<vmem>>, vector<8x32xf32>,
    %57 = arith.truncf %53 : vector<8x32xf32> to vector<8x32xbf16>
    %c0_30 = arith.constant 0 : index
    %c0_31 = arith.constant 0 : index
    %58 = vector.load %arg8[%c0_30, %c0_31] : memref<32x128xbf16, #tpu.memory_space<vmem>>, vector<32x128xbf16>
    %cst_32 = arith.constant dense<0.000000e+00> : vector<8x128xf32>
    %59 = tpu.matmul %57, %58, %cst_32 {dimension_numbers = #tpu.dot_dimension_numbers<[1], [0], [0], [1], [0, 0, 1, 1], [], []>} : vector<8x32xbf16>, vector<32x128xbf16>, vector<8x128xf32> -> vector<8x128xf32>
    %60 = vector.extract_strided_slice %59 {offsets = [0, 0], sizes = [8, 32], strides = [1, 1]} : vector<8x128xf32> to vector<8x32xf32>
    %c0_33 = arith.constant 0 : index
    %c0_34 = arith.constant 0 : index
    %61 = vector.load %arg19[%c0_33, %c0_34] : memref<8x32xf32, #tpu.memory_space<vmem>>, vector<8x32xf32>
    tpu.vector_store %arg19[%c0_33, %c0_34], %60 {strides = array<i32>} : memref<8x32xf32, #tpu.memory_space<vmem>>, vector<8x32xf32>,
    %62 = vector.extract_strided_slice %59 {offsets = [0, 32], sizes = [8, 1], strides = [1, 1]} : vector<8x128xf32> to vector<8x1xf32>
    %c0_35 = arith.constant 0 : index
    %c0_36 = arith.constant 0 : index
    %63 = vector.load %arg9[%c0_35, %c0_36] : memref<1x32xf32, #tpu.memory_space<vmem>>, vector<1x32xf32>
    %cst_37 = arith.constant dense<0.000000e+00> : vector<8x32xf32>
    %64 = tpu.matmul %62, %63, %cst_37 {dimension_numbers = #tpu.dot_dimension_numbers<[1], [0], [0], [1], [0, 0, 1, 1], [], []>} : vector<8x1xf32>, vector<1x32xf32>, vector<8x32xf32> -> vector<8x32xf32>
    %c0_38 = arith.constant 0 : index
    %c0_39 = arith.constant 0 : index
    %65 = vector.load %arg10[%c0_38, %c0_39] : memref<1x32xf32, #tpu.memory_space<vmem>>, vector<1x32xf32>
    %66 = vector.broadcast %65 : vector<1x32xf32> to vector<8x32xf32>
    %67 = arith.addf %64, %66 : vector<8x32xf32>
    %cst_40 = arith.constant 2.000000e+01 : f32
    %68 = vector.broadcast %cst_40 : f32 to vector<8x32xf32>
    %69 = arith.minimumf %67, %68 : vector<8x32xf32>
    %cst_41 = arith.constant 2.000000e+01 : f32
    %70 = vector.broadcast %cst_41 : f32 to vector<8x32xf32>
    %71 = arith.cmpf ogt, %67, %70 : vector<8x32xf32>
    %72 = math.exp %69 : vector<8x32xf32>
    %cst_42 = arith.constant 1.000000e+00 : f32
    %73 = vector.broadcast %cst_42 : f32 to vector<8x32xf32>
    %74 = arith.addf %73, %72 : vector<8x32xf32>
    %75 = math.log %74 : vector<8x32xf32>
    %76 = arith.select %71, %67, %75 : vector<8x32xi1>, vector<8x32xf32>
    %c0_43 = arith.constant 0 : index
    %c0_44 = arith.constant 0 : index
    %77 = vector.load %arg18[%c0_43, %c0_44] : memref<8x32xf32, #tpu.memory_space<vmem>>, vector<8x32xf32>
    tpu.vector_store %arg18[%c0_43, %c0_44], %76 {strides = array<i32>} : memref<8x32xf32, #tpu.memory_space<vmem>>, vector<8x32xf32>,
    %c0_45 = arith.constant 0 : index
    %c0_46 = arith.constant 0 : index
    %78 = vector.load %arg11[%c0_45, %c0_46] : memref<16x32xf32, #tpu.memory_space<vmem>>, vector<16x32xf32>
    %c0_47 = arith.constant 0 : index
    %c0_48 = arith.constant 0 : index
    %79 = vector.load %arg12[%c0_47, %c0_48] : memref<32x32xf32, #tpu.memory_space<vmem>>, vector<32x32xf32>
    %c0_49 = arith.constant 0 : index
    %c0_50 = arith.constant 0 : index
    %80 = vector.load %arg16[%c0_49, %c0_50] : memref<16x32xf32, #tpu.memory_space<vmem>>, vector<16x32xf32>
    %c0_i32_51 = arith.constant 0 : i32
    %c8_i32 = arith.constant 8 : i32
    %81 = arith.muli %c0_i32_51, %c8_i32 : i32
    %82 = tpu.assume_multiple %81, 8 : i32
    %c8_i32_52 = arith.constant 8 : i32
    %83 = arith.muli %c0_i32_51, %c8_i32_52 : i32
    %c8_i32_53 = arith.constant 8 : i32
    %84 = arith.addi %83, %c8_i32_53 : i32
    %85 = tpu.assume_multiple %84, 8 : i32
    %86 = arith.index_cast %82 : i32 to index
    %c0_54 = arith.constant 0 : index
    %87 = vector.load %arg18[%86, %c0_54] : memref<8x32xf32, #tpu.memory_space<vmem>>, vector<8x32xf32>
    %88 = arith.index_cast %85 : i32 to index
    %c0_55 = arith.constant 0 : index
    %89 = vector.load %arg17[%88, %c0_55] : memref<16x32xf32, #tpu.memory_space<vmem>>, vector<8x32xf32>
    %90 = arith.mulf %87, %89 : vector<8x32xf32>
    %91 = arith.index_cast %82 : i32 to index
    %c0_56 = arith.constant 0 : index
    %92 = vector.load %arg19[%91, %c0_56] : memref<8x32xf32, #tpu.memory_space<vmem>>, vector<8x32xf32>
    %cst_57 = arith.constant dense<0.000000e+00> : vector<32x8xf32>
    %93 = tpu.matmul %79, %92, %cst_57 {dimension_numbers = #tpu.dot_dimension_numbers<[1], [1], [0], [0], [0, 0, 1, 0], [], []>} : vector<32x32xf32>, vector<8x32xf32>, vector<32x8xf32> -> vector<32x8xf32>
    %94 = vector.extract_strided_slice %87 {offsets = [0, 0], sizes = [1, 32], strides = [1, 1]} : vector<8x32xf32> to vector<1x32xf32>
    %95 = vector.broadcast %94 : vector<1x32xf32> to vector<16x32xf32>
    %96 = arith.mulf %95, %78 : vector<16x32xf32>
    %97 = math.exp %96 : vector<16x32xf32>
    %98 = arith.mulf %97, %80 : vector<16x32xf32>
    %99 = vector.extract_strided_slice %93 {offsets = [0, 0], sizes = [16, 1], strides = [1, 1]} : vector<32x8xf32> to vector<16x1xf32>
    %100 = vector.extract_strided_slice %90 {offsets = [0, 0], sizes = [1, 32], strides = [1, 1]} : vector<8x32xf32> to vector<1x32xf32>
    %101 = vector.broadcast %99 : vector<16x1xf32> to vector<16x32xf32>
    %102 = vector.broadcast %100 : vector<1x32xf32> to vector<16x32xf32>
    %103 = arith.mulf %101, %102 : vector<16x32xf32>
    %104 = arith.addf %98, %103 : vector<16x32xf32>
    %105 = vector.extract_strided_slice %93 {offsets = [16, 0], sizes = [16, 1], strides = [1, 1]} : vector<32x8xf32> to vector<16x1xf32>
    %106 = vector.broadcast %105 : vector<16x1xf32> to vector<16x32xf32>
    %107 = arith.mulf %104, %106 : vector<16x32xf32>
    %cst_58 = arith.constant dense<0.000000e+00> : vector<32xf32>
    %108 = vector.multi_reduction <add>, %107, %cst_58 [0] : vector<16x32xf32> to vector<32xf32>
    %109 = vector.shape_cast %108 : vector<32xf32> to vector<1x32xf32>
    %110 = vector.extract_strided_slice %87 {offsets = [1, 0], sizes = [1, 32], strides = [1, 1]} : vector<8x32xf32> to vector<1x32xf32>
    %111 = vector.broadcast %110 : vector<1x32xf32> to vector<16x32xf32>
    %112 = arith.mulf %111, %78 : vector<16x32xf32>
    %113 = math.exp %112 : vector<16x32xf32>
    %114 = arith.mulf %113, %104 : vector<16x32xf32>
    %115 = vector.extract_strided_slice %93 {offsets = [0, 1], sizes = [16, 1], strides = [1, 1]} : vector<32x8xf32> to vector<16x1xf32>
    %116 = vector.extract_strided_slice %90 {offsets = [1, 0], sizes = [1, 32], strides = [1, 1]} : vector<8x32xf32> to vector<1x32xf32>
    %117 = vector.broadcast %115 : vector<16x1xf32> to vector<16x32xf32>
    %118 = vector.broadcast %116 : vector<1x32xf32> to vector<16x32xf32>
    %119 = arith.mulf %117, %118 : vector<16x32xf32>
    %120 = arith.addf %114, %119 : vector<16x32xf32>
    %121 = vector.extract_strided_slice %93 {offsets = [16, 1], sizes = [16, 1], strides = [1, 1]} : vector<32x8xf32> to vector<16x1xf32>
    %122 = vector.broadcast %121 : vector<16x1xf32> to vector<16x32xf32>
    %123 = arith.mulf %120, %122 : vector<16x32xf32>
    %cst_59 = arith.constant dense<0.000000e+00> : vector<32xf32>
    %124 = vector.multi_reduction <add>, %123, %cst_59 [0] : vector<16x32xf32> to vector<32xf32>
    %125 = vector.shape_cast %124 : vector<32xf32> to vector<1x32xf32>
    %126 = vector.extract_strided_slice %87 {offsets = [2, 0], sizes = [1, 32], strides = [1, 1]} : vector<8x32xf32> to vector<1x32xf32>
    %127 = vector.broadcast %126 : vector<1x32xf32> to vector<16x32xf32>
    %128 = arith.mulf %127, %78 : vector<16x32xf32>
    %129 = math.exp %128 : vector<16x32xf32>
    %130 = arith.mulf %129, %120 : vector<16x32xf32>
    %131 = vector.extract_strided_slice %93 {offsets = [0, 2], sizes = [16, 1], strides = [1, 1]} : vector<32x8xf32> to vector<16x1xf32>
    %132 = vector.extract_strided_slice %90 {offsets = [2, 0], sizes = [1, 32], strides = [1, 1]} : vector<8x32xf32> to vector<1x32xf32>
    %133 = vector.broadcast %131 : vector<16x1xf32> to vector<16x32xf32>
    %134 = vector.broadcast %132 : vector<1x32xf32> to vector<16x32xf32>
    %135 = arith.mulf %133, %134 : vector<16x32xf32>
    %136 = arith.addf %130, %135 : vector<16x32xf32>
    %137 = vector.extract_strided_slice %93 {offsets = [16, 2], sizes = [16, 1], strides = [1, 1]} : vector<32x8xf32> to vector<16x1xf32>
    %138 = vector.broadcast %137 : vector<16x1xf32> to vector<16x32xf32>
    %139 = arith.mulf %136, %138 : vector<16x32xf32>
    %cst_60 = arith.constant dense<0.000000e+00> : vector<32xf32>
    %140 = vector.multi_reduction <add>, %139, %cst_60 [0] : vector<16x32xf32> to vector<32xf32>
    %141 = vector.shape_cast %140 : vector<32xf32> to vector<1x32xf32>
    %142 = vector.extract_strided_slice %87 {offsets = [3, 0], sizes = [1, 32], strides = [1, 1]} : vector<8x32xf32> to vector<1x32xf32>
    %143 = vector.broadcast %142 : vector<1x32xf32> to vector<16x32xf32>
    %144 = arith.mulf %143, %78 : vector<16x32xf32>
    %145 = math.exp %144 : vector<16x32xf32>
    %146 = arith.mulf %145, %136 : vector<16x32xf32>
    %147 = vector.extract_strided_slice %93 {offsets = [0, 3], sizes = [16, 1], strides = [1, 1]} : vector<32x8xf32> to vector<16x1xf32>
    %148 = vector.extract_strided_slice %90 {offsets = [3, 0], sizes = [1, 32], strides = [1, 1]} : vector<8x32xf32> to vector<1x32xf32>
    %149 = vector.broadcast %147 : vector<16x1xf32> to vector<16x32xf32>
    %150 = vector.broadcast %148 : vector<1x32xf32> to vector<16x32xf32>
    %151 = arith.mulf %149, %150 : vector<16x32xf32>
    %152 = arith.addf %146, %151 : vector<16x32xf32>
    %153 = vector.extract_strided_slice %93 {offsets = [16, 3], sizes = [16, 1], strides = [1, 1]} : vector<32x8xf32> to vector<16x1xf32>
    %154 = vector.broadcast %153 : vector<16x1xf32> to vector<16x32xf32>
    %155 = arith.mulf %152, %154 : vector<16x32xf32>
    %cst_61 = arith.constant dense<0.000000e+00> : vector<32xf32>
    %156 = vector.multi_reduction <add>, %155, %cst_61 [0] : vector<16x32xf32> to vector<32xf32>
    %157 = vector.shape_cast %156 : vector<32xf32> to vector<1x32xf32>
    %158 = vector.extract_strided_slice %87 {offsets = [4, 0], sizes = [1, 32], strides = [1, 1]} : vector<8x32xf32> to vector<1x32xf32>
    %159 = vector.broadcast %158 : vector<1x32xf32> to vector<16x32xf32>
    %160 = arith.mulf %159, %78 : vector<16x32xf32>
    %161 = math.exp %160 : vector<16x32xf32>
    %162 = arith.mulf %161, %152 : vector<16x32xf32>
    %163 = vector.extract_strided_slice %93 {offsets = [0, 4], sizes = [16, 1], strides = [1, 1]} : vector<32x8xf32> to vector<16x1xf32>
    %164 = vector.extract_strided_slice %90 {offsets = [4, 0], sizes = [1, 32], strides = [1, 1]} : vector<8x32xf32> to vector<1x32xf32>
    %165 = vector.broadcast %163 : vector<16x1xf32> to vector<16x32xf32>
    %166 = vector.broadcast %164 : vector<1x32xf32> to vector<16x32xf32>
    %167 = arith.mulf %165, %166 : vector<16x32xf32>
    %168 = arith.addf %162, %167 : vector<16x32xf32>
    %169 = vector.extract_strided_slice %93 {offsets = [16, 4], sizes = [16, 1], strides = [1, 1]} : vector<32x8xf32> to vector<16x1xf32>
    %170 = vector.broadcast %169 : vector<16x1xf32> to vector<16x32xf32>
    %171 = arith.mulf %168, %170 : vector<16x32xf32>
    %cst_62 = arith.constant dense<0.000000e+00> : vector<32xf32>
    %172 = vector.multi_reduction <add>, %171, %cst_62 [0] : vector<16x32xf32> to vector<32xf32>
    %173 = vector.shape_cast %172 : vector<32xf32> to vector<1x32xf32>
    %174 = vector.extract_strided_slice %87 {offsets = [5, 0], sizes = [1, 32], strides = [1, 1]} : vector<8x32xf32> to vector<1x32xf32>
    %175 = vector.broadcast %174 : vector<1x32xf32> to vector<16x32xf32>
    %176 = arith.mulf %175, %78 : vector<16x32xf32>
    %177 = math.exp %176 : vector<16x32xf32>
    %178 = arith.mulf %177, %168 : vector<16x32xf32>
    %179 = vector.extract_strided_slice %93 {offsets = [0, 5], sizes = [16, 1], strides = [1, 1]} : vector<32x8xf32> to vector<16x1xf32>
    %180 = vector.extract_strided_slice %90 {offsets = [5, 0], sizes = [1, 32], strides = [1, 1]} : vector<8x32xf32> to vector<1x32xf32>
    %181 = vector.broadcast %179 : vector<16x1xf32> to vector<16x32xf32>
    %182 = vector.broadcast %180 : vector<1x32xf32> to vector<16x32xf32>
    %183 = arith.mulf %181, %182 : vector<16x32xf32>
    %184 = arith.addf %178, %183 : vector<16x32xf32>
    %185 = vector.extract_strided_slice %93 {offsets = [16, 5], sizes = [16, 1], strides = [1, 1]} : vector<32x8xf32> to vector<16x1xf32>
    %186 = vector.broadcast %185 : vector<16x1xf32> to vector<16x32xf32>
    %187 = arith.mulf %184, %186 : vector<16x32xf32>
    %cst_63 = arith.constant dense<0.000000e+00> : vector<32xf32>
    %188 = vector.multi_reduction <add>, %187, %cst_63 [0] : vector<16x32xf32> to vector<32xf32>
    %189 = vector.shape_cast %188 : vector<32xf32> to vector<1x32xf32>
    %190 = vector.extract_strided_slice %87 {offsets = [6, 0], sizes = [1, 32], strides = [1, 1]} : vector<8x32xf32> to vector<1x32xf32>
    %191 = vector.broadcast %190 : vector<1x32xf32> to vector<16x32xf32>
    %192 = arith.mulf %191, %78 : vector<16x32xf32>
    %193 = math.exp %192 : vector<16x32xf32>
    %194 = arith.mulf %193, %184 : vector<16x32xf32>
    %195 = vector.extract_strided_slice %93 {offsets = [0, 6], sizes = [16, 1], strides = [1, 1]} : vector<32x8xf32> to vector<16x1xf32>
    %196 = vector.extract_strided_slice %90 {offsets = [6, 0], sizes = [1, 32], strides = [1, 1]} : vector<8x32xf32> to vector<1x32xf32>
    %197 = vector.broadcast %195 : vector<16x1xf32> to vector<16x32xf32>
    %198 = vector.broadcast %196 : vector<1x32xf32> to vector<16x32xf32>
    %199 = arith.mulf %197, %198 : vector<16x32xf32>
    %200 = arith.addf %194, %199 : vector<16x32xf32>
    %201 = vector.extract_strided_slice %93 {offsets = [16, 6], sizes = [16, 1], strides = [1, 1]} : vector<32x8xf32> to vector<16x1xf32>
    %202 = vector.broadcast %201 : vector<16x1xf32> to vector<16x32xf32>
    %203 = arith.mulf %200, %202 : vector<16x32xf32>
    %cst_64 = arith.constant dense<0.000000e+00> : vector<32xf32>
    %204 = vector.multi_reduction <add>, %203, %cst_64 [0] : vector<16x32xf32> to vector<32xf32>
    %205 = vector.shape_cast %204 : vector<32xf32> to vector<1x32xf32>
    %206 = vector.extract_strided_slice %87 {offsets = [7, 0], sizes = [1, 32], strides = [1, 1]} : vector<8x32xf32> to vector<1x32xf32>
    %207 = vector.broadcast %206 : vector<1x32xf32> to vector<16x32xf32>
    %208 = arith.mulf %207, %78 : vector<16x32xf32>
    %209 = math.exp %208 : vector<16x32xf32>
    %210 = arith.mulf %209, %200 : vector<16x32xf32>
    %211 = vector.extract_strided_slice %93 {offsets = [0, 7], sizes = [16, 1], strides = [1, 1]} : vector<32x8xf32> to vector<16x1xf32>
    %212 = vector.extract_strided_slice %90 {offsets = [7, 0], sizes = [1, 32], strides = [1, 1]} : vector<8x32xf32> to vector<1x32xf32>
    %213 = vector.broadcast %211 : vector<16x1xf32> to vector<16x32xf32>
    %214 = vector.broadcast %212 : vector<1x32xf32> to vector<16x32xf32>
    %215 = arith.mulf %213, %214 : vector<16x32xf32>
    %216 = arith.addf %210, %215 : vector<16x32xf32>
    %217 = vector.extract_strided_slice %93 {offsets = [16, 7], sizes = [16, 1], strides = [1, 1]} : vector<32x8xf32> to vector<16x1xf32>
    %218 = vector.broadcast %217 : vector<16x1xf32> to vector<16x32xf32>
    %219 = arith.mulf %216, %218 : vector<16x32xf32>
    %cst_65 = arith.constant dense<0.000000e+00> : vector<32xf32>
    %220 = vector.multi_reduction <add>, %219, %cst_65 [0] : vector<16x32xf32> to vector<32xf32>
    %221 = vector.shape_cast %220 : vector<32xf32> to vector<1x32xf32>
    %222 = tpu.concatenate %109, %125, %141, %157, %173, %189, %205, %221 in 0 : vector<1x32xf32>, vector<1x32xf32>, vector<1x32xf32>, vector<1x32xf32>, vector<1x32xf32>, vector<1x32xf32>, vector<1x32xf32>, vector<1x32xf32> -> vector<8x32xf32>
    %223 = arith.index_cast %82 : i32 to index
    %c0_66 = arith.constant 0 : index
    %224 = vector.load %arg18[%223, %c0_66] : memref<8x32xf32, #tpu.memory_space<vmem>>, vector<8x32xf32>
    tpu.vector_store %arg18[%223, %c0_66], %222 {strides = array<i32>} : memref<8x32xf32, #tpu.memory_space<vmem>>, vector<8x32xf32>,
    %c1_i32 = arith.constant 1 : i32
    %c0_67 = arith.constant 0 : index
    %c0_68 = arith.constant 0 : index
    %225 = vector.load %arg16[%c0_67, %c0_68] : memref<16x32xf32, #tpu.memory_space<vmem>>, vector<16x32xf32>
    tpu.vector_store %arg16[%c0_67, %c0_68], %216 {strides = array<i32>} : memref<16x32xf32, #tpu.memory_space<vmem>>, vector<16x32xf32>,
    %c0_69 = arith.constant 0 : index
    %c0_70 = arith.constant 0 : index
    %226 = vector.load %arg18[%c0_69, %c0_70] : memref<8x32xf32, #tpu.memory_space<vmem>>, vector<8x32xf32>
    %c8_71 = arith.constant 8 : index
    %c0_72 = arith.constant 0 : index
    %227 = vector.load %arg17[%c8_71, %c0_72] : memref<16x32xf32, #tpu.memory_space<vmem>>, vector<8x32xf32>
    %c0_73 = arith.constant 0 : index
    %c0_74 = arith.constant 0 : index
    %228 = vector.load %arg13[%c0_73, %c0_74] : memref<1x32xf32, #tpu.memory_space<vmem>>, vector<1x32xf32>
    %229 = vector.broadcast %228 : vector<1x32xf32> to vector<8x32xf32>
    %230 = arith.mulf %227, %229 : vector<8x32xf32>
    %231 = arith.addf %226, %230 : vector<8x32xf32>
    %cst_75 = arith.constant 5.000000e-01 : f32
    %232 = vector.broadcast %cst_75 : f32 to vector<8x32xf32>
    %233 = arith.mulf %232, %22 : vector<8x32xf32>
    %cst_76 = arith.constant 5.000000e-01 : f32
    %234 = vector.broadcast %cst_76 : f32 to vector<8x32xf32>
    %235 = arith.mulf %234, %22 : vector<8x32xf32>
    %236 = math.tanh %235 : vector<8x32xf32>
    %cst_77 = arith.constant 1.000000e+00 : f32
    %237 = vector.broadcast %cst_77 : f32 to vector<8x32xf32>
    %238 = arith.addf %237, %236 : vector<8x32xf32>
    %239 = arith.mulf %233, %238 : vector<8x32xf32>
    %240 = arith.mulf %231, %239 : vector<8x32xf32>
    %241 = arith.truncf %240 : vector<8x32xf32> to vector<8x32xbf16>
    %c0_78 = arith.constant 0 : index
    %c0_79 = arith.constant 0 : index
    %242 = vector.load %arg14[%c0_78, %c0_79] : memref<32x16xbf16, #tpu.memory_space<vmem>>, vector<32x16xbf16>
    %cst_80 = arith.constant dense<0.000000e+00> : vector<8x16xf32>
    %243 = tpu.matmul %241, %242, %cst_80 {dimension_numbers = #tpu.dot_dimension_numbers<[1], [0], [0], [1], [0, 0, 1, 1], [], []>} : vector<8x32xbf16>, vector<32x16xbf16>, vector<8x16xf32> -> vector<8x16xf32>
    %c0_81 = arith.constant 0 : index
    %c0_82 = arith.constant 0 : index
    %c0_83 = arith.constant 0 : index
    %244 = vector.load %arg2[%c0_81, %c0_82, %c0_83] : memref<1x8x16xf32, #tpu.memory_space<vmem>>, vector<1x8x16xf32>
    %245 = vector.shape_cast %244 : vector<1x8x16xf32> to vector<8x16xf32>
    %246 = arith.addf %243, %245 : vector<8x16xf32>
    %c0_84 = arith.constant 0 : index
    %c0_85 = arith.constant 0 : index
    %c0_86 = arith.constant 0 : index
    %247 = vector.load %arg15[%c0_84, %c0_85, %c0_86] : memref<1x8x16xf32, #tpu.memory_space<vmem>>, vector<1x8x16xf32>
    %248 = vector.shape_cast %247 : vector<1x8x16xf32> to vector<8x16xf32>
    %249 = vector.shape_cast %246 : vector<8x16xf32> to vector<1x8x16xf32>
    tpu.vector_store %arg15[%c0_84, %c0_85, %c0_86], %249 {strides = array<i32>} : memref<1x8x16xf32, #tpu.memory_space<vmem>>, vector<1x8x16xf32>,
    return
  }
  func.func @transform_0(%arg0: i32, %arg1: i32) -> (i32, i32, i32) {
    %c0_i32 = arith.constant 0 : i32
    %c0_i32_0 = arith.constant 0 : i32
    return %arg0, %arg1, %c0_i32 : i32, i32, i32
  }
  func.func @transform_1(%arg0: i32, %arg1: i32) -> (i32, i32) {
    %c0_i32 = arith.constant 0 : i32
    %c0_i32_0 = arith.constant 0 : i32
    %c0_i32_1 = arith.constant 0 : i32
    return %c0_i32, %c0_i32_0 : i32, i32
  }
  func.func @transform_2(%arg0: i32, %arg1: i32) -> (i32, i32) {
    %c0_i32 = arith.constant 0 : i32
    %c0_i32_0 = arith.constant 0 : i32
    %c0_i32_1 = arith.constant 0 : i32
    return %c0_i32, %c0_i32_0 : i32, i32
  }
  func.func @transform_3(%arg0: i32, %arg1: i32) -> (i32, i32) {
    %c0_i32 = arith.constant 0 : i32
    %c0_i32_0 = arith.constant 0 : i32
    %c0_i32_1 = arith.constant 0 : i32
    return %c0_i32, %c0_i32_0 : i32, i32
  }
  func.func @transform_4(%arg0: i32, %arg1: i32) -> (i32, i32) {
    %c0_i32 = arith.constant 0 : i32
    %c0_i32_0 = arith.constant 0 : i32
    %c0_i32_1 = arith.constant 0 : i32
    return %c0_i32, %c0_i32_0 : i32, i32
  }
  func.func @transform_5(%arg0: i32, %arg1: i32) -> (i32, i32) {
    %c0_i32 = arith.constant 0 : i32
    %c0_i32_0 = arith.constant 0 : i32
    %c0_i32_1 = arith.constant 0 : i32
    return %c0_i32, %c0_i32_0 : i32, i32
  }
  func.func @transform_6(%arg0: i32, %arg1: i32) -> (i32, i32) {
    %c0_i32 = arith.constant 0 : i32
    %c0_i32_0 = arith.constant 0 : i32
    %c0_i32_1 = arith.constant 0 : i32
    return %c0_i32, %c0_i32_0 : i32, i32
  }
  func.func @transform_7(%arg0: i32, %arg1: i32) -> (i32, i32) {
    %c0_i32 = arith.constant 0 : i32
    %c0_i32_0 = arith.constant 0 : i32
    %c0_i32_1 = arith.constant 0 : i32
    return %c0_i32, %c0_i32_0 : i32, i32
  }
  func.func @transform_8(%arg0: i32, %arg1: i32) -> (i32, i32) {
    %c0_i32 = arith.constant 0 : i32
    %c0_i32_0 = arith.constant 0 : i32
    %c0_i32_1 = arith.constant 0 : i32
    return %c0_i32, %c0_i32_0 : i32, i32
  }
  func.func @transform_9(%arg0: i32, %arg1: i32) -> (i32, i32) {
    %c0_i32 = arith.constant 0 : i32
    %c0_i32_0 = arith.constant 0 : i32
    %c0_i32_1 = arith.constant 0 : i32
    return %c0_i32, %c0_i32_0 : i32, i32
  }
  func.func @transform_10(%arg0: i32, %arg1: i32) -> (i32, i32) {
    %c0_i32 = arith.constant 0 : i32
    %c0_i32_0 = arith.constant 0 : i32
    %c0_i32_1 = arith.constant 0 : i32
    return %c0_i32, %c0_i32_0 : i32, i32
  }
  func.func @transform_11(%arg0: i32, %arg1: i32) -> (i32, i32) {
    %c0_i32 = arith.constant 0 : i32
    %c0_i32_0 = arith.constant 0 : i32
    %c0_i32_1 = arith.constant 0 : i32
    return %c0_i32, %c0_i32_0 : i32, i32
  }
  func.func @transform_12(%arg0: i32, %arg1: i32) -> (i32, i32) {
    %c0_i32 = arith.constant 0 : i32
    %c0_i32_0 = arith.constant 0 : i32
    %c0_i32_1 = arith.constant 0 : i32
    return %c0_i32, %c0_i32_0 : i32, i32
  }
  func.func @transform_13(%arg0: i32, %arg1: i32) -> (i32, i32, i32) {
    %c0_i32 = arith.constant 0 : i32
    %c0_i32_0 = arith.constant 0 : i32
    return %arg0, %arg1, %c0_i32 : i32, i32, i32
  }
}

</mosaic_0001>

<bundles_post_ra>
// kernel: tpu_custom_call.1
= control target key start
LH: loop header
LB: loop body
LE: loop exit
PB: predicated region body
PF: predicated region fallthrough
CT: control target
= control target key end

     0   :  { %s3123_s0 = inlined_call_operand.hbm [shape: f32[2,16,16], index: 0, kind: input, shape index: {}]   ;;  %s3124_s1 = inlined_call_operand.vmem [shape: f32[1,16], index: 1, kind: input, shape index: {}]   ;;  %s3125_s2 = inlined_call_operand.vmem [shape: bf16[16,32], index: 2, kind: input, shape index: {}]   ;;  %s3126_s3 = inlined_call_operand.hbm [shape: bf16[16,32], index: 3, kind: input, shape index: {}]   ;;  %s3127_s4 = inlined_call_operand.hbm [shape: f32[4,32], index: 4, kind: input, shape index: {}]   ;;  %s3128_s5 = inlined_call_operand.hbm [shape: f32[1,32], index: 5, kind: input, shape index: {}]   ;;  %s3129_s6 = inlined_call_operand.vmem [shape: bf16[32,128], index: 6, kind: input, shape index: {}]   ;;  %s3130_s7 = inlined_call_operand.hbm [shape: f32[1,32], index: 7, kind: input, shape index: {}]   ;;  %s3131_s8 = inlined_call_operand.hbm [shape: f32[1,32], index: 8, kind: input, shape index: {}]   ;;  %s3132_s9 = inlined_call_operand.hbm [shape: f32[16,32], index: 9, kind: input, shape index: {}]   ;;  %s3133_s10 = inlined_call_operand.vmem [shape: f32[32,32], index: 10, kind: input, shape index: {}]   ;;  %s3134_s11 = inlined_call_operand.hbm [shape: f32[1,32], index: 11, kind: input, shape index: {}]   ;;  %s3135_s12 = inlined_call_operand.vmem [shape: bf16[32,16], index: 12, kind: input, shape index: {}]   ;;  %s3136_s13 = inlined_call_operand.hbm [shape: f32[2,16,16], index: 13, kind: output, shape index: {}]  }
   0x1   :  { %3147 = sst [smem:[#allocation30_spill]] %s3124_s1 }
   0x2   :  { %3148 = sst [smem:[#allocation31_spill]] %s3125_s2 }
   0x3   :  { %3149 = sst [smem:[#allocation32_spill]] %s3126_s3 }
   0x4   :  { %3150 = sst [smem:[#allocation33_spill]] %s3127_s4 }
   0x5   :  { %3151 = sst [smem:[#allocation34_spill]] %s3128_s5 }
   0x6   :  { %3152 = sst [smem:[#allocation35_spill]] %s3129_s6 }
   0x7   :  { %3153 = sst [smem:[#allocation36_spill]] %s3130_s7 }
   0x8   :  { %3154 = sst [smem:[#allocation37_spill]] %s3131_s8 }
   0x9   :  { %3155 = sst [smem:[#allocation38_spill]] %s3133_s10 }
   0xa   :  { %3156 = sst [smem:[#allocation39_spill]] %s3135_s12 }
   0xb   :  { %3157 = sst [smem:[#allocation40_spill]] %s3136_s13 }
   0xc   :  { %18 = vsyncpa [#allocation7], 0 }
   0xd   :  { %20 = vsyncpa [#allocation7 + $0x1], 0 }
   0xe   :  { %21 = vsyncpa [#allocation10], 0 }
   0xf   :  { %22 = vsyncpa [#allocation13], 0 }
  0x10   :  { %23 = vsyncpa [#allocation16], 0 }
  0x11   :  { %24 = vsyncpa [#allocation19], 0 }
  0x12   :  { %25 = vsyncpa [#allocation8], 0 }
  0x13   :  { %27 = vsyncpa [#allocation8 + $0x1], 0  ;;  %s2442_s25 = smov 0   ;;  %s2444_s26 = smov 0  }
  0x14   :  { %s2446_s27 = smov 0   ;;  %s2448_s28 = smov 0  }
  0x15   :  { %s2450_s29 = smov 0   ;;  %s2452_s30 = smov 0  }
  0x16   :  { %s2454_s14 = smov 0   ;;  %s2456_s15 = smov 0  }
  0x17 LB: > { %3158 = sst [smem:[#allocation27_spill]] %s2329_s28  ;;  %s3137_s16 = sadd.s32 4294967295, %s2345_s15   ;;  %s2345_s15 = sphi %s2456_s15, %s33_s15   ;;  %s2341_s14 = sphi %s2454_s14, %s3197_s14   ;;  %s2337_s30 = sphi %s2452_s30, %s3196_s30   ;;  %s2333_s29 = sphi %s2450_s29, %s3195_s29   ;;  %s2329_s28 = sphi %s2448_s28, %s3194_s28   ;;  %s2325_s27 = sphi %s2446_s27, %s3193_s27   ;;  %s2321_s26 = sphi %s2444_s26, %s3192_s26   ;;  %s2317_s25 = sphi %s2442_s25, %s3191_s25  }
  0x18   : > { %3159 = sst [smem:[#allocation28_spill]] %s2333_s29  ;;  %p1653_p0 = scmp.ge.s32.totalorder %s2345_s15, 1 }
  0x19   : > { %p2486_p1 = scmp.eq.s32.totalorder %s3137_s16, 0  ;;  %p358_p2 = scmp.lt.s32.totalorder %s2345_s15, 5 }
  0x1a   : > { %s2347_s19 = smov [#allocation9]   ;;  %s2348_s22 = smov [#allocation12]  }
  0x1b   : > { %s3160_s17 = scalar_select %p2486_p1, 1, 0 }
  0x1c   : > { %p2491_p3 = pnand %p1653_p0, %p358_p2  ;;  %s376_s20 = sshll.u32 %s2347_s19, 4  ;;  %s2495_s20 = int_to_ptr.vmem [resolvable:$true] %s376_s20 }
  0x1d   : > { %s401_s23 = sshll.u32 %s2348_s22, 4  ;;  %s2349_s24 = smov [#allocation15]   ;;  %s2505_s23 = int_to_ptr.vmem [resolvable:$true] %s401_s23 }
  0x1e   : > { %s3161_s18 = scalar_select %p2491_p3, 1, 0 }
  0x1f   : > { %p1792_p4 = pneg %p2491_p3  ;;  %s2507_s16 = sshll.u32 %s2349_s24, 4  ;;  %s427_s16 = int_to_ptr.vmem [resolvable:$true] %s2507_s16 }
  0x20   : > { %3162 = sst [smem:[#allocation29_spill]] %s3161_s18  ;;  %s3164_s3 = sld [smem:[#allocation32_spill]] }
  0x21   : > { %p2501_p5 = pnand %p1792_p4, %p2486_p1 }
  0x23   : > { %p2517_p7 = pneg %p2501_p5 }
  0x26   : > { %s2005_s19 = scalar_lea.hbm %s3164_s3, 128 }
  0x27   : > { %p2006_p6 = scmp.ne.s32.totalorder %s3164_s3, %s2005_s19  ;;  %p2012_p10 = scmp.lt.u32.totalorder %s2005_s19, %s3164_s3 }
  0x29   : > { %p2008_p8 = pnand %p2517_p7, %p2006_p6 }
  0x2b   : > { %p2009_p9 = pneg %p2008_p8 }
  0x2d   : > { %p2014_p11 = pnand %p2012_p10, %p2009_p9 }
  0x2f   : > { %2017 = shalt.err (!%p2014_p11)
}
  0x30   : > { %s2018_s10 = scalar_lea.vmem %s2495_s20, 128  ;;  %p2026_p2 = scmp.lt.s32.totalorder %s2495_s20, %s2495_s20 }
  0x31   : > { %p2019_p12 = scmp.ne.s32.totalorder %s2495_s20, %s2018_s10  ;;  %p2027_p4 = scmp.lt.s32.totalorder %s2018_s10, %s2018_s10 }
  0x33   : > { %p2021_p13 = pnand %p2019_p12, %p2517_p7  ;;  %p2028_p6 = por %p2027_p4, %p2026_p2 }
  0x35   : > { %p2022_p0 = pneg %p2021_p13 }
  0x37   : > { %p2029_p8 = pnand %p2028_p6, %p2022_p0 }
  0x39   : > { %2032 = shalt.err (!%p2029_p8)
}
  0x3a   : > { %s2350_s12 = smov 64   ;;  %s2351_s13 = smov 4  }
  0x3b   : > { %1795 = dma.hbm_to_vmem [thread:$0]  (!%p2501_p5), %s3164_s3, 128, %s2495_s20, [#allocation10], %s2350_s12, %s2350_s12, %s2351_s13  }
  0x3c   : > { %s3166_s5 = sld [smem:[#allocation34_spill]] }
  0x42   : > { %s2033_s1 = scalar_lea.hbm %s3166_s5, 16 }
  0x43   : > { %p2034_p9 = scmp.ne.s32.totalorder %s3166_s5, %s2033_s1  ;;  %p2040_p12 = scmp.lt.u32.totalorder %s2033_s1, %s3166_s5 }
  0x45   : > { %p2036_p10 = pnand %p2034_p9, %p2517_p7 }
  0x47   : > { %p2037_p11 = pneg %p2036_p10 }
  0x49   : > { %p2042_p13 = pnand %p2040_p12, %p2037_p11 }
  0x4b   : > { %2045 = shalt.err (!%p2042_p13)
}
  0x4c   : > { %s2046_s20 = scalar_lea.vmem %s2505_s23, 16  ;;  %s2053_s2 = scalar_lea.vmem %s2505_s23, 32 }
  0x4d   : > { %p2047_p0 = scmp.ne.s32.totalorder %s2505_s23, %s2046_s20  ;;  %p2054_p6 = scmp.lt.s32.totalorder %s2505_s23, %s2505_s23 }
  0x4e   : > { %p2055_p8 = scmp.lt.s32.totalorder %s2053_s2, %s2046_s20 }
  0x4f   : > { %p2049_p2 = pnand %p2047_p0, %p2517_p7 }
  0x50   : > { %p2056_p9 = por %p2055_p8, %p2054_p6 }
  0x51   : > { %p2050_p4 = pneg %p2049_p2 }
  0x53   : > { %p2057_p10 = pnand %p2056_p9, %p2050_p4 }
  0x55   : > { %2060 = shalt.err (!%p2057_p10)
}
  0x56   : > { %1801 = dma.hbm_to_vmem [thread:$0]  (!%p2501_p5), %s3166_s5, 16, %s2505_s23, [#allocation13]  }
  0x57   : > { %s3167_s8 = sld [smem:[#allocation37_spill]] }
  0x5d   : > { %s2061_s13 = scalar_lea.hbm %s3167_s8, 16 }
  0x5e   : > { %p2062_p11 = scmp.ne.s32.totalorder %s3167_s8, %s2061_s13  ;;  %p2068_p0 = scmp.lt.u32.totalorder %s2061_s13, %s3167_s8 }
  0x60   : > { %p2064_p12 = pnand %p2062_p11, %p2517_p7 }
  0x62   : > { %p2065_p13 = pneg %p2064_p12 }
  0x64   : > { %p2070_p2 = pnand %p2068_p0, %p2065_p13 }
  0x66   : > { %2073 = shalt.err (!%p2070_p2)
}
  0x67   : > { %s2074_s10 = scalar_lea.vmem %s427_s16, 16  ;;  %s2081_s23 = scalar_lea.vmem %s427_s16, 32 }
  0x68   : > { %p2075_p4 = scmp.ne.s32.totalorder %s427_s16, %s2074_s10  ;;  %p2082_p9 = scmp.lt.s32.totalorder %s427_s16, %s427_s16 }
  0x69   : > { %p2083_p10 = scmp.lt.s32.totalorder %s2081_s23, %s2074_s10 }
  0x6a   : > { %p2077_p6 = pnand %p2075_p4, %p2517_p7 }
  0x6b   : > { %p2084_p3 = por %p2083_p10, %p2082_p9 }
  0x6c   : > { %p2078_p8 = pneg %p2077_p6 }
  0x6e   : > { %p2085_p1 = pnand %p2084_p3, %p2078_p8 }
  0x70   : > { %2088 = shalt.err (!%p2085_p1)
}
  0x71   : > { %1807 = dma.hbm_to_vmem [thread:$0]  (!%p2501_p5), %s3167_s8, 16, %s427_s16, [#allocation16]  }
  0x72   : > { %s2352_s1 = smov [#allocation11]   ;;  %s2353_s18 = smov [#allocation14]  }
  0x73   : > { %s390_s28 = sshll.u32 %s2352_s1, 4  ;;  %s415_s12 = sshll.u32 %s2353_s18, 4  ;;  %s391_s28 = int_to_ptr.vmem [resolvable:$true] %s390_s28  ;;  %s416_s12 = int_to_ptr.vmem [resolvable:$true] %s415_s12 }
  0x74   : > { %s3168_s4 = sld [smem:[#allocation33_spill]] }
  0x7a   : > { %s2089_s19 = scalar_lea.hbm %s3168_s4, 64 }
  0x7b   : > { %p2090_p1 = scmp.ne.s32.totalorder %s3168_s4, %s2089_s19  ;;  %p2096_p12 = scmp.lt.u32.totalorder %s2089_s19, %s3168_s4 }
  0x7d   : > { %p2092_p3 = pnand %p2090_p1, %p2517_p7 }
  0x7f   : > { %p2093_p11 = pneg %p2092_p3 }
  0x81   : > { %p2098_p13 = pnand %p2096_p12, %p2093_p11 }
  0x83   : > { %2101 = shalt.err (!%p2098_p13)
}
  0x84   : > { %s2102_s16 = scalar_lea.vmem %s391_s28, 64  ;;  %p2110_p6 = scmp.lt.s32.totalorder %s391_s28, %s391_s28 }
  0x85   : > { %p2103_p0 = scmp.ne.s32.totalorder %s391_s28, %s2102_s16  ;;  %p2111_p8 = scmp.lt.s32.totalorder %s2102_s16, %s2102_s16 }
  0x87   : > { %p2105_p2 = pnand %p2103_p0, %p2517_p7  ;;  %p2112_p9 = por %p2111_p8, %p2110_p6 }
  0x89   : > { %p2106_p4 = pneg %p2105_p2 }
  0x8b   : > { %p2113_p10 = pnand %p2112_p9, %p2106_p4 }
  0x8d   : > { %2116 = shalt.err (!%p2113_p10)
}
  0x8e   : > { %1798 = dma.hbm_to_vmem [thread:$0]  (!%p2501_p5), %s3168_s4, 64, %s391_s28, [#allocation10]  }
  0x8f   : > { %s3169_s7 = sld [smem:[#allocation36_spill]] }
  0x95   : > { %s2117_s13 = scalar_lea.hbm %s3169_s7, 16 }
  0x96   : > { %p2118_p1 = scmp.ne.s32.totalorder %s3169_s7, %s2117_s13  ;;  %p2124_p12 = scmp.lt.u32.totalorder %s2117_s13, %s3169_s7 }
  0x98   : > { %p2120_p3 = pnand %p2118_p1, %p2517_p7 }
  0x9a   : > { %p2121_p11 = pneg %p2120_p3 }
  0x9c   : > { %p2126_p13 = pnand %p2124_p12, %p2121_p11 }
  0x9e   : > { %2129 = shalt.err (!%p2126_p13)
}
  0x9f   : > { %s2130_s10 = scalar_lea.vmem %s416_s12, 16  ;;  %s2137_s28 = scalar_lea.vmem %s416_s12, 32 }
  0xa0   : > { %p2131_p0 = scmp.ne.s32.totalorder %s416_s12, %s2130_s10  ;;  %p2138_p6 = scmp.lt.s32.totalorder %s416_s12, %s416_s12 }
  0xa1   : > { %p2139_p8 = scmp.lt.s32.totalorder %s2137_s28, %s2130_s10 }
  0xa2   : > { %p2133_p2 = pnand %p2131_p0, %p2517_p7 }
  0xa3   : > { %p2140_p9 = por %p2139_p8, %p2138_p6 }
  0xa4   : > { %p2134_p4 = pneg %p2133_p2 }
  0xa6   : > { %p2141_p10 = pnand %p2140_p9, %p2134_p4 }
  0xa8   : > { %2144 = shalt.err (!%p2141_p10)
}
  0xa9   : > { %1804 = dma.hbm_to_vmem [thread:$0]  (!%p2501_p5), %s3169_s7, 16, %s416_s12, [#allocation13]  }
  0xaa   : > { %s2354_s20 = smov [#allocation17]   ;;  %s2145_s13 = scalar_lea.hbm %s3132_s9, 256 }
  0xab   : > { %s436_s2 = sshll.u32 %s2354_s20, 4  ;;  %p2146_p1 = scmp.ne.s32.totalorder %s3132_s9, %s2145_s13  ;;  %s437_s2 = int_to_ptr.vmem [resolvable:$true] %s436_s2 }
  0xac   : > { %p2152_p12 = scmp.lt.u32.totalorder %s2145_s13, %s3132_s9 }
  0xad   : > { %p2148_p3 = pnand %p2146_p1, %p2517_p7 }
  0xaf   : > { %p2149_p11 = pneg %p2148_p3 }
  0xb1   : > { %p2154_p13 = pnand %p2152_p12, %p2149_p11 }
  0xb3   : > { %2157 = shalt.err (!%p2154_p13)
}
  0xb4   : > { %s2158_s12 = scalar_lea.vmem %s437_s2, 256  ;;  %p2166_p6 = scmp.lt.s32.totalorder %s437_s2, %s437_s2 }
  0xb5   : > { %p2159_p0 = scmp.ne.s32.totalorder %s437_s2, %s2158_s12  ;;  %p2167_p8 = scmp.lt.s32.totalorder %s2158_s12, %s2158_s12 }
  0xb7   : > { %p2161_p2 = pnand %p2159_p0, %p2517_p7  ;;  %p2168_p9 = por %p2167_p8, %p2166_p6 }
  0xb9   : > { %p2162_p4 = pneg %p2161_p2 }
  0xbb   : > { %p2169_p10 = pnand %p2168_p9, %p2162_p4 }
  0xbd   : > { %2172 = shalt.err (!%p2169_p10)
}
  0xbe   : > { %s2355_s10 = smov 128   ;;  %s2356_s28 = smov 8  }
  0xbf   : > { %1810 = dma.hbm_to_vmem [thread:$0]  (!%p2501_p5), %s3132_s9, 256, %s437_s2, [#allocation16], %s2355_s10, %s2355_s10, %s2356_s28  }
  0xc0   : > { %s2357_s20 = smov [#allocation18]   ;;  %s2173_s29 = scalar_lea.hbm %s3134_s11, 16 }
  0xc1   : > { %s453_s1 = sshll.u32 %s2357_s20, 4  ;;  %p2174_p1 = scmp.ne.s32.totalorder %s3134_s11, %s2173_s29  ;;  %s454_s1 = int_to_ptr.vmem [resolvable:$true] %s453_s1 }
  0xc2   : > { %p2180_p12 = scmp.lt.u32.totalorder %s2173_s29, %s3134_s11 }
  0xc3   : > { %p2176_p3 = pnand %p2174_p1, %p2517_p7 }
  0xc5   : > { %p2177_p11 = pneg %p2176_p3 }
  0xc7   : > { %p2182_p13 = pnand %p2180_p12, %p2177_p11 }
  0xc9   : > { %2185 = shalt.err (!%p2182_p13)
}
  0xca   : > { %s2186_s2 = scalar_lea.vmem %s454_s1, 16  ;;  %s2193_s10 = scalar_lea.vmem %s454_s1, 32 }
  0xcb   : > { %p2187_p0 = scmp.ne.s32.totalorder %s454_s1, %s2186_s2  ;;  %p2194_p6 = scmp.lt.s32.totalorder %s454_s1, %s454_s1 }
  0xcc   : > { %p2195_p8 = scmp.lt.s32.totalorder %s2193_s10, %s2186_s2 }
  0xcd   : > { %p2189_p2 = pnand %p2187_p0, %p2517_p7 }
  0xce   : > { %p2196_p9 = por %p2195_p8, %p2194_p6 }
  0xcf   : > { %p2190_p4 = pneg %p2189_p2 }
  0xd1   : > { %p2197_p10 = pnand %p2196_p9, %p2190_p4 }
  0xd3   : > { %2200 = shalt.err (!%p2197_p10)
}
  0xd4   : > { %1813 = dma.hbm_to_vmem [thread:$0]  (!%p2501_p5), %s3134_s11, 16, %s454_s1, [#allocation19]  }
  0xd5   : > { %s1652_s6 = sadd.s32 4294967294, %s2345_s15   ;;  %s42_s16 = sadd.s32 1, %s2337_s30 }
  0xd6   : > { %s45_s21 = sadd.s32 1, %s2341_s14  ;;  %p43_p7 = scmp.ge.s32.totalorder %s42_s16, 2 }
  0xd7   : > { %s54_s20 = sadd.s32 1, %s2325_s27  ;;  %p61_p1 = scmp.ne.s32.totalorder %s2325_s27, %s2321_s26 }
  0xd8   : > { %p62_p3 = scmp.eq.s32.totalorder %s2345_s15, 0  ;;  %s3199_s16 = smov (%p43_p7, %s42_s16), 0 }
  0xd9   : > { %s3201_s21 = smov (!%p43_p7, %s45_s21), %s2341_s14  ;;  %s50_s18 = ssub.s32 %s2337_s30, %s3199_s16 }
  0xda   : > { %p2665_p11 = por %p62_p3, %p61_p1  ;;  %p47_p5 = scmp.ge.s32.totalorder %s3201_s21, 2 }
  0xdb   : > { %p67_p12 = scmp.ne.s32.totalorder %s2321_s26, %s2317_s25  ;;  %s3171_s1 = sadd.s32 4294967295, %s2345_s15  }
  0xdc   : > { %p345_p13 = scmp.eq.s32.totalorder %s3171_s1, 3  ;;  %p351_p0 = scmp.eq.s32.totalorder %s1652_s6, 3 }
  0xdd   : > { %s3203_s21 = smov (%p47_p5, %s3201_s21), 0  ;;  %p3172_p2 = scmp.ne.s32.totalorder %s3160_s17, 0 }
  0xde   : > { %p2681_p6 = por %p345_p13, %p61_p1  ;;  %s49_s22 = ssub.s32 %s2341_s14, %s3203_s21 }
  0xdf   : > { %p2677_p4 = por %p3172_p2, %p67_p12  ;;  %p2687_p8 = por %p351_p0, %p67_p12 }
  0xe0   : > { %s3174_s19 = scalar_select %p2681_p6, 1, 0 }
  0xe1   : > { %s3175_s24 = scalar_select %p2687_p8, 1, 0 }
  0xe2   : > { %s51_s12 = sor.u32 %s50_s18, %s49_s22  ;;  %p1829_p9 = scmp.lt.s32.totalorder %s2345_s15, 4 }
  0xe3   : > { %p52_p10 = scmp.eq.s32.totalorder %s51_s12, 0  ;;  %s467_s2 = sand.u32 1, %s2325_s27  }
  0xe4   : > { %s1662_s10 = sshll.u32 %s467_s2, 3  ;;  %s1663_s23 = sshll.u32 %s2341_s14, 1 }
  0xe5   : > { %s2694_s28 = scalar_select %p52_p10, %s2325_s27, %s54_s20  }
  0xe6   : > { %s476_s6 = sadd.s32 %s2337_s30, %s1663_s23  ;;  %s471_s1 = scalar_lea.vmem [#allocation6], %s1662_s10 }
  0xe7   : > { %s480_s3 = sshll.u32 %s471_s1, 4  ;;  %s1664_s4 = sshll.u32 %s476_s6, 7  ;;  %s2698_s3 = int_to_ptr.vmem [resolvable:$true] %s480_s3 }
  0xe8   : > { %s2703_s8 = scalar_lea.hbm %s3123_s0, %s1664_s4  ;;  %p2707_p7 = pnand %p1829_p9, %p2665_p11 }
  0xe9   : > { %s468_s18 = scalar_lea.sflag [#allocation7], %s467_s2  ;;  %s2201_s22 = scalar_lea.hbm %s2703_s8, 128 }
  0xea   : > { %p2202_p1 = scmp.ne.s32.totalorder %s2703_s8, %s2201_s22  ;;  %p2203_p3 = pneg %p2707_p7 }
  0xeb   : > { %s2206_s7 = scalar_lea.hbm %s3123_s0, 512  ;;  %p2207_p11 = scmp.lt.u32.totalorder %s2703_s8, %s3123_s0 }
  0xec   : > { %p2204_p5 = pnand %p2203_p3, %p2202_p1  ;;  %p2208_p13 = scmp.lt.u32.totalorder %s2206_s7, %s2201_s22 }
  0xed   : > { %p2210_p2 = scmp.lt.u32.totalorder %s2201_s22, %s2703_s8 }
  0xee   : > { %p2205_p12 = pneg %p2204_p5  ;;  %p2209_p0 = por %p2208_p13, %p2207_p11 }
  0xf0   : > { %p2211_p9 = por %p2210_p2, %p2209_p0 }
  0xf2   : > { %p2212_p10 = pnand %p2211_p9, %p2205_p12 }
  0xf4   : > { %2215 = shalt.err (!%p2212_p10)
}
  0xf5   : > { %s2216_s2 = scalar_lea.vmem %s2698_s3, 128  ;;  %s2358_s10 = smov [#allocation6]  }
  0xf6   : > { %p2217_p1 = scmp.ne.s32.totalorder %s2698_s3, %s2216_s2  ;;  %s2221_s23 = sshll.u32 %s2358_s10, 4  ;;  %s2222_s23 = int_to_ptr.vmem [resolvable:$false] %s2221_s23 }
  0xf7   : > { %s2223_s6 = scalar_lea.vmem %s2222_s23, 256  ;;  %p2224_p6 = scmp.lt.s32.totalorder %s2698_s3, %s2222_s23 }
  0xf8   : > { %p2219_p5 = pnand %p2217_p1, %p2203_p3  ;;  %p2225_p11 = scmp.lt.s32.totalorder %s2223_s6, %s2216_s2 }
  0xfa   : > { %p2220_p8 = pneg %p2219_p5  ;;  %p2226_p13 = por %p2225_p11, %p2224_p6 }
  0xfc   : > { %p2227_p0 = pnand %p2226_p13, %p2220_p8 }
  0xfe   : > { %2230 = shalt.err (!%p2227_p0)
}
  0xff   : > { %1817 = dma.hbm_to_vmem [thread:$0]  (!%p2707_p7), %s2703_s8, 128, %s2698_s3, %s468_s18  }
 0x100   : > { %s3177_s1 = sld [smem:[#allocation29_spill]] }
 0x106   : > { %p3178_p12 = scmp.ne.s32.totalorder %s3177_s1, 0 }
 0x107   : > { %s2739_s22 = sand.u32 (!%p3178_p12), 1, %s2321_s26  }
 0x108   : > { %489 = sbr.rel (%p3178_p12) target bundleno = 1751 (0x6d7), region = 72  ;;  %s1666_s4 = sshll.u32 (!%p3178_p12), %s2739_s22, 3 }
 0x109   : > { %s492_s5 = scalar_lea.sflag (!%p3178_p12), [#allocation7], %s2739_s22  ;;  %s495_s7 = scalar_lea.vmem (!%p3178_p12), [#allocation6], %s1666_s4 }
 0x10f   : > { %2292 = dma.done.wait (%p2677_p4), %s492_s5, 128  }
 0x110   : > { %2294 = vsyncadd (%p2677_p4), %s492_s5, 4294967168  ;;  %p3179_p6 = scmp.ne.s32.totalorder %s3160_s17, 0 }
 0x112   : > { %2296 = dma.done.wait (%p3179_p6), [#allocation10], 192  }
 0x113   : > { %2298 = vsyncadd (%p3179_p6), [#allocation10], 4294967104 }
 0x114   : > { %2300 = dma.done.wait (%p3179_p6), [#allocation13], 32  }
 0x115   : > { %2302 = vsyncadd (%p3179_p6), [#allocation13], 4294967264 }
 0x116   : > { %2304 = dma.done.wait (%p3179_p6), [#allocation16], 272  }
 0x117   : > { %2306 = vsyncadd (%p3179_p6), [#allocation16], 4294967024 }
 0x118   : > { %2308 = dma.done.wait (%p3179_p6), [#allocation19], 16  }
 0x119   : > { %2310 = vsyncadd (%p3179_p6), [#allocation19], 4294967280  ;;  %s2763_s3 = scalar_lea.vmem [#allocation20], %s1666_s4  ;;  %s3180_s8 = sld [smem:[#allocation27_spill]] }
 0x11f   : > { %p1675_p4 = scmp.ne.s32.totalorder %s3180_s8, 0 }
 0x120   : > { %vm571_vm0 = vcmask (!%p1675_p4), 261120   ;;  %v2359_v0 = vmov (!%p1675_p4), 0.0  }
 0x121   : > { %570 = sbr.rel (%p1675_p4) target bundleno = 296 (0x128), region = 108  ;;  %572 = vst.msk [vmem:[#allocation2] sm:$0xff] (!%p1675_p4), %vm571_vm0, %v2359_v0  ;;  %573 = vst.msk [vmem:[#allocation2 + $0x8] sm:$0xff] (!%p1675_p4), %vm571_vm0, %v2359_v0 }
 0x122   : > { %574 = vst.msk [vmem:[#allocation3] sm:$0xff] (!%p1675_p4), %vm571_vm0, %v2359_v0 }
 0x128 PF: > { %v2766_v1 = vld [vmem:[%s495_s7] sm:$0xff]  ;;  %vm577_vm1 = vcmask 130048   ;;  %s3181_s20 = sld [smem:[#allocation31_spill]]  ;;  %v1958_v5 = vld [vmem:[#allocation9] sm:$0xff]   ;;  %v2360_v6 = vmov 0.0   ;;  %vm2361_vm2 = vmmov 0   ;;  %v698_v17 = vlaneseq }
 0x129   : > { %v576_v2 = vmul.f32 %v2766_v1, %v2766_v1  ;;  %1719 = vmatprep.subr.bf16.mxu0 %v2360_v6  ;;  %1725 = vmatprep.subr.bf16.mxu1 %v2360_v6  ;;  %s3182_s12 = sld [smem:[#allocation30_spill]]  ;;  %s3183_s23 = sld [smem:[#allocation35_spill]]  ;;  %vm694_vm3 = vcmask 261120   ;;  %v696_v20 = vld [vmem:[#allocation11] sm:$0xf]  ;;  %vm813_vm4 = vcmask 1040384  }
 0x12a   : > { %1726 = vmatpush3.bf16.msra.mxu1 %v1958_v5  ;;  %1721 = vmatprep.mubr.msk.bf16.mxu0 %vm2361_vm2, %v2360_v6  ;;  %v2800_v18 = vshrl.u32 %v698_v17, 7  ;;  %v1681_v35 = vld [vmem:[#allocation12] ss:$0 sm:$0xff]  ;;  %v799_v54 = vld [vmem:[#allocation14] sm:$0x1]  ;;  %s2362_s4 = smov 96  }
 0x12b   : > { %v578_v3 = vsel %vm577_vm1, %v576_v2, 0.0  ;;  %1727 = vmatprep.mubr.msk.bf16.mxu1 %vm2361_vm2, %v2360_v6  ;;  %1739 = vmatprep.subr.mxu1 %v2360_v6  ;;  %vm810_vm5 = vcmask 7168   ;;  %s3184_s8 = sld [smem:[#allocation38_spill]]  ;;  %v2363_v2 = vmov 3   ;;  %v2367_v17 = vmov 5   ;;  %s3185_s6 = sld [smem:[#allocation39_spill]] }
 0x12c   : > { %579 = vadd.xlane.f32.xlu0 %v578_v3  ;;  %v2803_v19 = vsub.s32 3, %v2800_v18  ;;  %v2810_v24 = vsub.s32 0, %v2800_v18  ;;  %v2813_v29 = vsub.s32 1, %v2800_v18  ;;  %v2817_v34 = vsub.s32 2, %v2800_v18  ;;  %s3186_s5 = sld [smem:[#allocation28_spill]]  ;;  %s3187_s7 = sld [smem:[#allocation27_spill]] }
 0x12d   : > { %1928 = vset.pattern.permute.xlu0 %v2363_v2  ;;  %v2364_v3 = vmov 0   ;;  %vm1390_vm7 = vcmask 1041408   ;;  %vm1392_vm8 = vcmask 1042432   ;;  %vm1394_vm9 = vcmask 1043456   ;;  %s1499_s18 = sshll.u32 %s2763_s3, 4  ;;  %s3188_s2 = sld [smem:[#allocation40_spill]]  ;;  %s3069_s18 = int_to_ptr.vmem [resolvable:$true] %s1499_s18 }
 0x12e   : > { %v1957_v4 = vld [vmem:[%s3181_s20] sm:$0xff]   ;;  %v701_v23 = vrot.slane %v696_v20, %v2803_v19  ;;  %v714_v33 = vrot.slane %v696_v20, %v2810_v24  ;;  %v721_v36 = vrot.slane %v696_v20, %v2813_v29  ;;  %v728_v42 = vrot.slane %v696_v20, %v2817_v34  ;;  %1925 = vset.pattern.permute.xlu1 %v2364_v3  ;;  %s1484_s1 = scalar_lea.sflag [#allocation8], %s2739_s22  ;;  %p3189_p7 = scmp.ne.s32.totalorder %s3174_s19, 0 }
 0x12f   : > { %1720 = vmatpush3.bf16.msra.mxu0 %v1957_v4  ;;  %v1676_v11 = vld [vmem:[%s3182_s12] ss:$0 sm:$0xff]  ;;  %v1960_v16 = vld [vmem:[%s3183_s23 + $0x8] sm:$0xff]   ;;  %v1685_v4 = vld [vmem:[#allocation15] ss:$0 sm:$0xff]  ;;  %v2368_v20 = vmov 2  }
 0x130   : > { %1731 = vmatprep.subr.bf16.mxu0 %v2360_v6  ;;  %v1959_v15 = vld [vmem:[%s3183_s23] sm:$0xff]   ;;  %vm1396_vm10 = vcmask 1044480   ;;  %vm1398_vm11 = vcmask 1045504   ;;  %vm1400_vm12 = vcmask 1046528  }
 0x131   : > { %v898_v60 = vld [vmem:[%s3184_s8] sm:$0xff]  ;;  %v899_v62 = vld [vmem:[%s3184_s8 + $0x8] sm:$0xff]  ;;  %v900_v63 = vld [vmem:[%s3184_s8 + $0x10] sm:$0xff] }
 0x132   : > { %v901_v0 = vld [vmem:[%s3184_s8 + $0x18] sm:$0xff]  ;;  %s1698_s17 = sshll.u32 %s3186_s5, 1  ;;  %s2371_s5 = smov [#allocation20]  }
 0x133   : > { %s1495_s29 = sadd.s32 %s3187_s7, %s1698_s17  ;;  %s2235_s7 = sshll.u32 %s2371_s5, 4  ;;  %s2236_s7 = int_to_ptr.vmem [resolvable:$false] %s2235_s7 }
 0x134   : > { %s1699_s20 = sshll.u32 %s1495_s29, 7  ;;  %s2237_s17 = scalar_lea.vmem %s2236_s7, 256 }
 0x135   : > { %s3067_s10 = scalar_lea.hbm %s3188_s2, %s1699_s20  ;;  %p2238_p9 = scmp.lt.s32.totalorder %s3069_s18, %s2236_s7 }
 0x1b9   : > { %v580_v7 = vpop.xlane.xlu0 %579 }
 0x1ba   : > { %v582_v8 = vmul.f32 0.0625, %v580_v7 }
 0x1bc   : > { %v583_v9 = vadd.f32 1e-05, %v582_v8 }
 0x1be   : > { %1963 = vrsqrt.f32 %v583_v9 }
 0x1c8   : > { %v1964_v10 = vpop.eup %1963 }
 0x1c9   : > { %v585_v12 = vmul.f32 %v1964_v10, %v2766_v1 }
 0x1cb   : > { %v593_v13 = vmul.f32 %v1676_v11, %v585_v12 }
 0x1cd   : > { %v594_v14 = vpack.c.bf16 %v593_v13, %v593_v13 }
 0x1cf   : > { %1722 = vmatmul.mubr.msk.bf16.vlgmr.msra.gmra.mrb[0].mxu0 %vm577_vm1, %v594_v14  ;;  %1728 = vmatmul.mubr.msk.bf16.vlgmr.msra.gmra.mrb[0].mxu1 %vm577_vm1, %v594_v14  ;;  %v2365_v14 = vmov 6  }
 0x1d0   : > { %1735 = vmatprep.mubr.msk.bf16.mxu0 %vm2361_vm2, %v2360_v6  ;;  %1741 = vmatprep.mubr.msk.f32.mxu1 %vm2361_vm2, %v2360_v6 }
 0x1d1   : > { %1732 = vmatpush3.bf16.msra.mxu0 %v1959_v15  ;;  %1740 = vmatpush3.msk.msra.mxu1 %vm813_vm4, %v799_v54  ;;  %v2366_v15 = vmov 1  }
 0x1d2   : > { %1733 = vmatprep.subr.bf16.mxu0 %v2360_v6 }
 0x1d5   : > { %1734 = vmatpush3.bf16.msra.mxu0 %v1960_v16 }
 0x1d6   : > { %1752 = vmatprep.subr.bf16.mxu0 %v2360_v6 }
 0x2a2   : > { %v640_v21 = vpop.f32.mrb[0].mxu0  ;;  %v2805_v22 = vpop.f32.mrb[0].mxu1 }
 0x2a3   : > { %695 = vst.msk [vmem:[#allocation3 + $0x8] sm:$0xff] %vm694_vm3, %v640_v21  ;;  %v1723_v25 = vpop.f32.mrb[1].mxu0  ;;  %v1729_v26 = vpop.f32.mrb[1].mxu1  ;;  %v702_v32 = vmul.f32 %v701_v23, %v640_v21 }
 0x2a4   : > { %v643_v27 = vpop.f32.mrb[2].mxu0  ;;  %v691_v28 = vpop.f32.mrb[2].mxu1  ;;  %v2369_v25 = vmov 4   ;;  %v2370_v26 = vmov 7  }
 0x2a5   : > { %v1724_v30 = vpop.f32.mrb[3].mxu0  ;;  %v1730_v31 = vpop.f32.mrb[3].mxu1  ;;  %v709_v40 = vadd.f32 %v1681_v35, %v702_v32 }
 0x2aa   : > { %v710_v37 = vld [vmem:[#allocation3 + $0x5] sm:$0xff] }
 0x2ab   : > { %v717_v38 = vld [vmem:[#allocation3 + $0x6] sm:$0xff]  ;;  %v715_v41 = vmul.f32 %v714_v33, %v710_v37 }
 0x2ac   : > { %v724_v39 = vld [vmem:[#allocation3 + $0x7] sm:$0xff]  ;;  %v722_v45 = vmul.f32 %v721_v36, %v717_v38 }
 0x2ad   : > { %v735_v43 = vld [vmem:[#allocation3 + $0x8] sm:$0xff]  ;;  %v716_v44 = vadd.f32 %v715_v41, %v709_v40  ;;  %v729_v47 = vmul.f32 %v728_v42, %v724_v39 }
 0x2ae   : > { %736 = vst.msk [vmem:[#allocation3] sm:$0xff] %vm694_vm3, %v735_v43  ;;  %v2868_v33 = vld [vmem:[#allocation17 + $0x8] sm:$0xff]  ;;  %v1203_v43 = vsub.s32 4, %v2800_v18 }
 0x2af   : > { %v723_v46 = vadd.f32 %v722_v45, %v716_v44 }
 0x2b1   : > { %v730_v48 = vadd.f32 %v729_v47, %v723_v46 }
 0x2b3   : > { %v731_v49 = vmul.f32 0.5, %v730_v48  ;;  %v1250_v48 = vsub.s32 5, %v2800_v18 }
 0x2b5   : > { %1965 = vtanh.f32 %v731_v49 }
 0x2bf   : > { %v1966_v50 = vpop.eup %1965 }
 0x2c0   : > { %v733_v51 = vadd.f32 1.0, %v1966_v50 }
 0x2c2   : > { %v734_v52 = vmul.f32 %v733_v51, %v731_v49  ;;  %v903_v51 = vld [vmem:[#allocation2 + $0x8] sm:$0xff] }
 0x2c4   : > { %737 = vst.msk [vmem:[#allocation3 + $0x8] sm:$0xff] %vm694_vm3, %v734_v52  ;;  %v738_v53 = vpack.c.bf16 %v734_v52, %v734_v52 }
 0x2c6   : > { %1736 = vmatmul.mubr.msk.bf16.vlgmr.msra.gmra.mrb[4].mxu0 %vm694_vm3, %v738_v53  ;;  %v1297_v53 = vsub.s32 6, %v2800_v18 }
 0x2c7   : > { %1756 = vmatprep.mubr.msk.bf16.mxu0 %vm2361_vm2, %v2360_v6 }
 0x2cb   : > { %v2887_v44 = vld [vmem:[#allocation3 + $0x8] sm:$0xff] }
 0x399   : > { %v792_v55 = vpop.f32.mrb[4].mxu0 }
 0x39a   : > { %798 = vst.msk [vmem:[#allocation5] sm:$0xff] %vm694_vm3, %v792_v55  ;;  %808 = vrot.lane.b32.xlu0 %v792_v55, %s2362_s4  ;;  %v1737_v56 = vpop.f32.mrb[5].mxu0  ;;  %s2231_s4 = scalar_lea.vmem %s3069_s18, 128 }
 0x39b   : > { %v795_v57 = vpop.f32.mrb[6].mxu0  ;;  %p2232_p8 = scmp.ne.s32.totalorder %s3069_s18, %s2231_s4  ;;  %p2239_p10 = scmp.lt.s32.totalorder %s2237_s17, %s2231_s4 }
 0x39c   : > { %v1738_v58 = vpop.f32.mrb[7].mxu0 }
 0x39d   : > { %p2233_p3 = pnand %p2232_p8, %p3189_p7  ;;  %p2240_p1 = por %p2239_p10, %p2238_p9 }
 0x39f   : > { %p2234_p2 = pneg %p2233_p3 }
 0x3a1   : > { %v908_v59 = vld [vmem:[#allocation5] sm:$0xff]  ;;  %p2241_p5 = pnand %p2240_p1, %p2234_p2 }
 0x3a2   : > { %1744 = vmatprep.subr.msk.mxu1 %vm694_vm3, %v908_v59 }
 0x40c   : > { %v809_v61 = vpop.permute.xlu0 %808 }
 0x40d   : > { %1742 = vmatmul.mubr.msk.f32.vlgmr.msra.gmra.mrb[4].mxu1 %vm810_vm5, %v809_v61 }
 0x40e   : > { %1745 = vmatpush3.xpose.msk.msra.mxu1 %vm694_vm3, %v908_v59  ;;  %1746 = vmatprep.mubr.msk.f32.mxu1 %vm694_vm3, %v898_v60 }
 0x411   : > { %1747 = vmatmul.mubr.msk.f32.vlgmr.msra.gmra.mrb[6].mxu1 %vm694_vm3, %v899_v62  ;;  %v1344_v62 = vsub.s32 7, %v2800_v18 }
 0x412   : > { %1749 = vmatprep.mubr.msk.f32.mxu1 %vm694_vm3, %v900_v63  ;;  %v1962_v63 = vld [vmem:[%s3185_s6 + $0x8] sm:$0xff]  }
 0x415   : > { %1750 = vmatmul.mubr.msk.f32.gmra.mrb[8].mxu1 %vm694_vm3, %v901_v0 }
 0x4e0   : > { %v883_v5 = vpop.f32.mrb[4].mxu1 }
 0x4e1   : > { %v884_v7 = vadd.f32 %v1685_v4, %v883_v5  ;;  %v1743_v8 = vpop.f32.mrb[5].mxu1 }
 0x4e3   : > { %v887_v9 = vmin.f32 %v884_v7, 20.0  ;;  %vm888_vm6 = vcmp.gt.f32.partialorder %v884_v7, 20.0 }
 0x4e4   : > { %v1748_v10 = vpop.f32.mrb[6].mxu1 }
 0x4e5   : > { %v889_v11 = vmul.f32 1.442695, %v887_v9  ;;  %1171 = vperm.xlu0 %1928, %v1748_v10   ;;  %1028 = vperm.xlu1 %1925, %v1748_v10   ;;  %v990_v12 = vpop.f32.mrb[7].mxu1  ;;  %v2931_v9 = vld [vmem:[#allocation17] sm:$0xff] }
 0x4e7   : > { %1967 = vpow2.f32 %v889_v11 }
 0x4e8   : > { %v1751_v13 = vpop.f32.mrb[8].mxu1 }
 0x4e9   : > { %1931 = vset.pattern.permute.xlu0 %v2365_v14  ;;  %1926 = vset.pattern.permute.xlu1 %v2366_v15  ;;  %v2848_v16 = vpop.f32.mrb[9].mxu1 }
 0x4ea   : > { %1312 = vperm.xlu0 %1931, %v1748_v10   ;;  %1077 = vperm.xlu1 %1926, %v1748_v10  }
 0x4ee   : > { %1938 = vset.pattern.permute.xlu0 %v2367_v17  ;;  %1927 = vset.pattern.permute.xlu1 %v2368_v20 }
 0x4ef   : > { %1124 = vperm.xlu1 %1927, %v1748_v10   ;;  %1261 = vperm.xlu0 %1938, %v990_v12  }
 0x4f1   : > { %v1968_v21 = vpop.eup %1967 }
 0x4f2   : > { %v891_v23 = vadd.f32 1.0, %v1968_v21 }
 0x4f3   : > { %1929 = vset.pattern.permute.xlu1 %v2369_v25  ;;  %1940 = vset.pattern.permute.xlu0 %v2370_v26 }
 0x4f4   : > { %1969 = vlog2.f32 %v891_v23  ;;  %1218 = vperm.xlu1 %1929, %v1748_v10   ;;  %1355 = vperm.xlu0 %1940, %v990_v12  }
 0x4f8   : > { %1930 = vset.pattern.permute.xlu1 %v2367_v17  ;;  %1943 = vset.pattern.permute.xlu0 %v2368_v20 }
 0x4f9   : > { %1265 = vperm.xlu1 %1930, %v1748_v10   ;;  %1140 = vperm.xlu0 %1943, %v1751_v13  }
 0x4fd   : > { %1932 = vset.pattern.permute.xlu1 %v2370_v26  ;;  %1945 = vset.pattern.permute.xlu0 %v2369_v25 }
 0x4fe   : > { %v1970_v27 = vpop.eup %1969  ;;  %1359 = vperm.xlu1 %1932, %v1748_v10   ;;  %1234 = vperm.xlu0 %1945, %v1751_v13  }
 0x4ff   : > { %v893_v28 = vmul.f32 0.6931472, %v1970_v27 }
 0x501   : > { %v894_v30 = vsel %vm888_vm6, %v884_v7, %v893_v28 }
 0x502   : > { %895 = vst.msk [vmem:[#allocation4] sm:$0xff] %vm694_vm3, %v894_v30  ;;  %1933 = vset.pattern.permute.xlu1 %v2364_v3  ;;  %1949 = vset.pattern.permute.xlu0 %v2366_v15 }
 0x503   : > { %1023 = vperm.xlu1 %1933, %v990_v12   ;;  %1089 = vperm.xlu0 %1949, %v2848_v16  }
 0x507   : > { %1934 = vset.pattern.permute.xlu1 %v2366_v15  ;;  %1954 = vset.pattern.permute.xlu0 %v2365_v14 }
 0x508   : > { %1073 = vperm.xlu1 %1934, %v990_v12   ;;  %1324 = vperm.xlu0 %1954, %v2848_v16  }
 0x509   : > { %v904_v31 = vld [vmem:[#allocation4] sm:$0xff] }
 0x50a   : > { %v1012_v32 = vrot.slane %v904_v31, %v2810_v24  ;;  %v2873_v36 = vrot.slane %v904_v31, %v2813_v29  ;;  %v2879_v39 = vrot.slane %v904_v31, %v2817_v34  ;;  %v2884_v42 = vrot.slane %v904_v31, %v2803_v19 }
 0x50b   : > { %v2890_v45 = vmul.f32 %v2887_v44, %v904_v31  ;;  %v2895_v49 = vrot.slane %v904_v31, %v1203_v43  ;;  %v2904_v56 = vrot.slane %v904_v31, %v1250_v48  ;;  %v2916_v61 = vrot.slane %v904_v31, %v1297_v53 }
 0x50c   : > { %1935 = vset.pattern.permute.xlu1 %v2368_v20  ;;  %1956 = vset.pattern.permute.xlu0 %v2370_v26  ;;  %v1014_v35 = vmul.f32 %v1012_v32, %v2868_v33  ;;  %v1065_v38 = vmul.f32 %v2873_v36, %v2868_v33  ;;  %v1112_v41 = vmul.f32 %v2879_v39, %v2868_v33 }
 0x50d   : > { %1120 = vperm.xlu1 %1935, %v990_v12   ;;  %1375 = vperm.xlu0 %1956, %v1751_v13   ;;  %v1159_v47 = vmul.f32 %v2884_v42, %v2868_v33  ;;  %v2899_v52 = vrot.slane %v2890_v45, %v2810_v24  ;;  %v1206_v57 = vmul.f32 %v2895_v49, %v2868_v33  ;;  %v1961_v24 = vld [vmem:[%s3185_s6] sm:$0xff]  }
 0x50e   : > { %v1017_v37 = vmul.f32 1.442695, %v1014_v35  ;;  %v1068_v40 = vmul.f32 1.442695, %v1065_v38  ;;  %v1115_v46 = vmul.f32 1.442695, %v1112_v41  ;;  %1753 = vmatpush3.bf16.msra.mxu0 %v1961_v24  ;;  %v1300_v10 = vmul.f32 %v2916_v61, %v2868_v33 }
 0x50f   : > { %v1162_v55 = vmul.f32 1.442695, %v1159_v47  ;;  %v1209_v4 = vmul.f32 1.442695, %v1206_v57  ;;  %1754 = vmatprep.subr.bf16.mxu0 %v2360_v6  ;;  %v1064_v35 = vmul.f32 %v2873_v36, %v2931_v9  ;;  %v2970_v47 = vrot.slane %v2890_v45, %v1250_v48 }
 0x510   : > { %1971 = vpow2.f32 %v1017_v37  ;;  %v1303_v21 = vmul.f32 1.442695, %v1300_v10  ;;  %v2981_v57 = vrot.slane %v2890_v45, %v1297_v53 }
 0x511   : > { %1936 = vset.pattern.permute.xlu1 %v2363_v2  ;;  %1973 = vpow2.f32 %v1068_v40 }
 0x512   : > { %1167 = vperm.xlu1 %1936, %v990_v12   ;;  %1975 = vpow2.f32 %v1115_v46  ;;  %1755 = vmatpush3.bf16.msra.mxu0 %v1962_v63  ;;  %v1066_v46 = vmul.f32 1.442695, %v1064_v35 }
 0x513   : > { %1977 = vpow2.f32 %v1162_v55 }
 0x514   : > { %1979 = vpow2.f32 %v1209_v4  ;;  %v902_v4 = vld [vmem:[#allocation2] sm:$0xff] }
 0x516   : > { %1937 = vset.pattern.permute.xlu1 %v2369_v25 }
 0x517   : > { %1214 = vperm.xlu1 %1937, %v990_v12  }
 0x51a   : > { %v1972_v50 = vpop.eup %1971 }
 0x51b   : > { %1939 = vset.pattern.permute.xlu1 %v2365_v14  ;;  %v1020_v58 = vmul.f32 %v1972_v50, %v903_v51  ;;  %v1974_v0 = vpop.eup %1973 }
 0x51c   : > { %1308 = vperm.xlu1 %1939, %v990_v12   ;;  %v2939_v12 = vrot.slane %v904_v31, %v1344_v62  ;;  %v1976_v6 = vpop.eup %1975 }
 0x51e   : > { %v1347_v23 = vmul.f32 %v2939_v12, %v2868_v33 }
 0x520   : > { %1941 = vset.pattern.permute.xlu1 %v2364_v3 }
 0x521   : > { %1046 = vperm.xlu1 %1941, %v1751_v13  }
 0x525   : > { %1942 = vset.pattern.permute.xlu1 %v2366_v15 }
 0x526   : > { %1093 = vperm.xlu1 %1942, %v1751_v13  }
 0x52a   : > { %1944 = vset.pattern.permute.xlu1 %v2363_v2 }
 0x52b   : > { %1187 = vperm.xlu1 %1944, %v1751_v13  }
 0x52f   : > { %1946 = vset.pattern.permute.xlu1 %v2367_v17 }
 0x530   : > { %1281 = vperm.xlu1 %1946, %v1751_v13  }
 0x534   : > { %1947 = vset.pattern.permute.xlu1 %v2365_v14 }
 0x535   : > { %1328 = vperm.xlu1 %1947, %v1751_v13   ;;  %v2943_v13 = vrot.slane %v2890_v45, %v2817_v34  ;;  %v1978_v34 = vpop.eup %1977 }
 0x539   : > { %1948 = vset.pattern.permute.xlu1 %v2364_v3  ;;  %v1253_v3 = vmul.f32 %v2904_v56, %v2868_v33  ;;  %v2963_v33 = vrot.slane %v2890_v45, %v1203_v43  ;;  %v1111_v43 = vmul.f32 %v2879_v39, %v2931_v9  ;;  %v1158_v39 = vmul.f32 %v2884_v42, %v2931_v9 }
 0x53a   : > { %1041 = vperm.xlu1 %1948, %v2848_v16  }
 0x53b   : > { %v1256_v11 = vmul.f32 1.442695, %v1253_v3 }
 0x53d   : > { %1981 = vpow2.f32 %v1256_v11  ;;  %v1160_v11 = vmul.f32 1.442695, %v1158_v39 }
 0x53e   : > { %1950 = vset.pattern.permute.xlu1 %v2368_v20  ;;  %1983 = vpow2.f32 %v1303_v21 }
 0x53f   : > { %1136 = vperm.xlu1 %1950, %v2848_v16  }
 0x543   : > { %1951 = vset.pattern.permute.xlu1 %v2363_v2  ;;  %v2924_v2 = vrot.slane %v2890_v45, %v2813_v29 }
 0x544   : > { %1183 = vperm.xlu1 %1951, %v2848_v16  }
 0x548   : > { %1952 = vset.pattern.permute.xlu1 %v2369_v25  ;;  %v2952_v25 = vrot.slane %v2890_v45, %v2803_v19  ;;  %v1980_v19 = vpop.eup %1979 }
 0x549   : > { %1230 = vperm.xlu1 %1952, %v2848_v16   ;;  %v1982_v50 = vpop.eup %1981 }
 0x54a   : > { %v1984_v24 = vpop.eup %1983 }
 0x54d   : > { %1953 = vset.pattern.permute.xlu1 %v2367_v17 }
 0x54e   : > { %1277 = vperm.xlu1 %1953, %v2848_v16  }
 0x552   : > { %1955 = vset.pattern.permute.xlu1 %v2370_v26 }
 0x553   : > { %1371 = vperm.xlu1 %1955, %v2848_v16   ;;  %v1013_v16 = vmul.f32 %v1012_v32, %v2931_v9  ;;  %v1350_v32 = vmul.f32 1.442695, %v1347_v23 }
 0x555   : > { %v1015_v27 = vmul.f32 1.442695, %v1013_v16 }
 0x557   : > { %1985 = vpow2.f32 %v1015_v27 }
 0x558   : > { %1987 = vpow2.f32 %v1350_v32 }
 0x559   : > { %1989 = vpow2.f32 %v1066_v46 }
 0x561   : > { %v1986_v3 = vpop.eup %1985 }
 0x564   : > { %v1029_v54 = vpop.permute.xlu1 %1028  ;;  %v1172_v20 = vpop.permute.xlu0 %1171 }
 0x565   : > { %v1036_v59 = vmul.f32 %v2899_v52, %v1029_v54  ;;  %v1179_v28 = vmul.f32 %v2952_v25, %v1172_v20 }
 0x567   : > { %v2912_v60 = vadd.f32 %v1036_v59, %v1020_v58  ;;  %v1113_v59 = vmul.f32 1.442695, %v1111_v43 }
 0x569   : > { %v1071_v5 = vmul.f32 %v1974_v0, %v2912_v60  ;;  %v1078_v7 = vpop.permute.xlu1 %1077  ;;  %v1313_v55 = vpop.permute.xlu0 %1312  ;;  %1991 = vpow2.f32 %v1113_v59 }
 0x56a   : > { %v1085_v8 = vmul.f32 %v2924_v2, %v1078_v7  ;;  %v1320_v63 = vmul.f32 %v2981_v57, %v1313_v55  ;;  %v1988_v7 = vpop.eup %1987  ;;  %1993 = vpow2.f32 %v1160_v11 }
 0x56c   : > { %v2935_v29 = vadd.f32 %v1085_v8, %v1071_v5  ;;  %v1365_v5 = vrot.slane %v2890_v45, %v1344_v62  ;;  %v1205_v8 = vmul.f32 %v2895_v49, %v2931_v9  ;;  %v1990_v45 = vpop.eup %1989  ;;  %v1252_v49 = vmul.f32 %v2904_v56, %v2931_v9 }
 0x56d   : > { %v1346_v56 = vmul.f32 %v2939_v12, %v2931_v9 }
 0x56e   : > { %v1118_v14 = vmul.f32 %v1976_v6, %v2935_v29  ;;  %v1125_v15 = vpop.permute.xlu1 %1124  ;;  %v1019_v6 = vmul.f32 %v1986_v3, %v902_v4  ;;  %v1207_v62 = vmul.f32 1.442695, %v1205_v8  ;;  %v1254_v27 = vmul.f32 1.442695, %v1252_v49  ;;  %v1262_v43 = vpop.permute.xlu0 %1261 }
 0x56f   : > { %v1132_v17 = vmul.f32 %v2943_v13, %v1125_v15 }
 0x570   : > { %1995 = vpow2.f32 %v1207_v62 }
 0x571   : > { %v2954_v26 = vadd.f32 %v1132_v17, %v1118_v14  ;;  %1997 = vpow2.f32 %v1254_v27 }
 0x573   : > { %v1165_v30 = vmul.f32 %v1978_v34, %v2954_v26  ;;  %v1219_v31 = vpop.permute.xlu1 %1218  ;;  %v1992_v23 = vpop.eup %1991  ;;  %v1299_v34 = vmul.f32 %v2916_v61, %v2931_v9 }
 0x574   : > { %v1226_v40 = vmul.f32 %v2963_v33, %v1219_v31  ;;  %v1994_v35 = vpop.eup %1993  ;;  %v1356_v9 = vpop.permute.xlu0 %1355 }
 0x575   : > { %v2960_v37 = vadd.f32 %v1179_v28, %v1165_v30 }
 0x577   : > { %v1212_v38 = vmul.f32 %v1980_v19, %v2960_v37  ;;  %v1301_v19 = vmul.f32 1.442695, %v1299_v34 }
 0x578   : > { %v1266_v41 = vpop.permute.xlu1 %1265  ;;  %v1141_v3 = vpop.permute.xlu0 %1140 }
 0x579   : > { %v2972_v36 = vadd.f32 %v1226_v40, %v1212_v38  ;;  %v1273_v54 = vmul.f32 %v2970_v47, %v1266_v41  ;;  %1999 = vpow2.f32 %v1301_v19  ;;  %v1348_v41 = vmul.f32 1.442695, %v1346_v56 }
 0x57a   : > { %v1996_v61 = vpop.eup %1995  ;;  %v1144_v27 = vmul.f32 %v1141_v3, %v2954_v26 }
 0x57b   : > { %v1259_v51 = vmul.f32 %v1982_v50, %v2972_v36  ;;  %2001 = vpow2.f32 %v1348_v41  ;;  %v1998_v55 = vpop.eup %1997 }
 0x57d   : > { %v2983_v58 = vadd.f32 %v1273_v54, %v1259_v51  ;;  %v1360_v48 = vpop.permute.xlu1 %1359 }
 0x57e   : > { %v1367_v42 = vmul.f32 %v1365_v5, %v1360_v48  ;;  %v1272_v48 = vmul.f32 %v2970_v47, %v1262_v43  ;;  %v1235_v47 = vpop.permute.xlu0 %1234 }
 0x57f   : > { %v1306_v0 = vmul.f32 %v1984_v24, %v2983_v58 }
 0x581   : > { %v2992_v53 = vadd.f32 %v1320_v63, %v1306_v0 }
 0x582   : > { %v1024_v10 = vpop.permute.xlu1 %1023 }
 0x583   : > { %v1035_v14 = vmul.f32 %v2899_v52, %v1024_v10  ;;  %v1353_v15 = vmul.f32 %v1988_v7, %v2992_v53  ;;  %v2000_v24 = vpop.eup %1999  ;;  %v1366_v7 = vmul.f32 %v1365_v5, %v1356_v9 }
 0x585   : > { %v2998_v16 = vadd.f32 %v1035_v14, %v1019_v6  ;;  %v3000_v18 = vadd.f32 %v1367_v42, %v1353_v15  ;;  %v2002_v4 = vpop.eup %2001  ;;  %v1090_v14 = vpop.permute.xlu0 %1089 }
 0x587   : > { %v1070_v17 = vmul.f32 %v1990_v45, %v2998_v16  ;;  %v1074_v20 = vpop.permute.xlu1 %1073  ;;  %1404 = vst.msk [vmem:[#allocation2 + $0x8] sm:$0xff] %vm694_vm3, %v3000_v18 }
 0x588   : > { %v1084_v52 = vmul.f32 %v2924_v2, %v1074_v20 }
 0x58a   : > { %v1086_v21 = vadd.f32 %v1084_v52, %v1070_v17 }
 0x58c   : > { %v1117_v28 = vmul.f32 %v1992_v23, %v1086_v21  ;;  %v1121_v30 = vpop.permute.xlu1 %1120  ;;  %v1096_v15 = vmul.f32 %v1090_v14, %v1086_v21 }
 0x58d   : > { %v1131_v31 = vmul.f32 %v2943_v13, %v1121_v30 }
 0x58e   : > { %v1098_v62 = vsel %vm694_vm3, %v1096_v15, 0.0 }
 0x58f   : > { %v1133_v32 = vadd.f32 %v1131_v31, %v1117_v28 }
 0x591   : > { %v1164_v38 = vmul.f32 %v1994_v35, %v1133_v32  ;;  %v1168_v2 = vpop.permute.xlu1 %1167 }
 0x592   : > { %v1178_v40 = vmul.f32 %v2952_v25, %v1168_v2 }
 0x594   : > { %v1180_v46 = vadd.f32 %v1178_v40, %v1164_v38  ;;  %v1146_v38 = vsel %vm694_vm3, %v1144_v27, 0.0 }
 0x596   : > { %v1211_v50 = vmul.f32 %v1996_v61, %v1180_v46  ;;  %v1215_v51 = vpop.permute.xlu1 %1214 }
 0x597   : > { %v1225_v13 = vmul.f32 %v2963_v33, %v1215_v51 }
 0x599   : > { %v3015_v54 = vadd.f32 %v1225_v13, %v1211_v50 }
 0x59b   : > { %v1258_v12 = vmul.f32 %v1998_v55, %v3015_v54  ;;  %v1309_v59 = vpop.permute.xlu1 %1308 }
 0x59c   : > { %v1319_v63 = vmul.f32 %v2981_v57, %v1309_v59 }
 0x59d   : > { %v3019_v25 = vadd.f32 %v1272_v48, %v1258_v12 }
 0x59f   : > { %v1305_v39 = vmul.f32 %v2000_v24, %v3019_v25 }
 0x5a0   : > { %v1047_v0 = vpop.permute.xlu1 %1046 }
 0x5a1   : > { %v1321_v33 = vadd.f32 %v1319_v63, %v1305_v39  ;;  %v1050_v49 = vmul.f32 %v1047_v0, %v2912_v60  ;;  %v1325_v60 = vpop.permute.xlu0 %1324  ;;  %v1238_v39 = vmul.f32 %v1235_v47, %v2972_v36 }
 0x5a3   : > { %v1352_v8 = vmul.f32 %v2002_v4, %v1321_v33  ;;  %v1331_v2 = vmul.f32 %v1325_v60, %v1321_v33 }
 0x5a5   : > { %v1094_v10 = vpop.permute.xlu1 %1093  ;;  %v3023_v11 = vadd.f32 %v1366_v7, %v1352_v8 }
 0x5a6   : > { %v1097_v42 = vmul.f32 %v1094_v10, %v2935_v29  ;;  %v1052_v29 = vsel %vm694_vm3, %v1050_v49, 0.0 }
 0x5a7   : > { %1403 = vst.msk [vmem:[#allocation2] sm:$0xff] %vm694_vm3, %v3023_v11 }
 0x5a8   : > { %v1099_v57 = vsel %vm694_vm3, %v1097_v42, 0.0  ;;  %v1240_v42 = vsel %vm694_vm3, %v1238_v39, 0.0 }
 0x5a9   : > { %v1100_v17 = vadd.f32 %v1099_v57, %v1098_v62 }
 0x5aa   : > { %v1188_v6 = vpop.permute.xlu1 %1187 }
 0x5ab   : > { %v1101_v20 = vrot.slane %v1100_v17, 4  ;;  %v1191_v26 = vmul.f32 %v1188_v6, %v2960_v37 }
 0x5ad   : > { %v1102_v52 = vadd.f32 %v1101_v20, %v1100_v17  ;;  %v1193_v9 = vsel %vm694_vm3, %v1191_v26, 0.0 }
 0x5af   : > { %v1282_v45 = vpop.permute.xlu1 %1281  ;;  %v1103_v28 = vrot.slane %v1102_v52, 2 }
 0x5b0   : > { %v1285_v36 = vmul.f32 %v1282_v45, %v2983_v58 }
 0x5b1   : > { %v1104_v40 = vadd.f32 %v1103_v28, %v1102_v52 }
 0x5b4   : > { %v1329_v5 = vpop.permute.xlu1 %1328 }
 0x5b5   : > { %v1332_v35 = vmul.f32 %v1329_v5, %v2992_v53  ;;  %v1105_v53 = vrot.slane %v1104_v40, 1  ;;  %v1376_v5 = vpop.permute.xlu0 %1375 }
 0x5b6   : > { %v1379_v58 = vmul.f32 %v1376_v5, %v3000_v18 }
 0x5b7   : > { %v1334_v43 = vsel %vm694_vm3, %v1332_v35, 0.0  ;;  %v1106_v33 = vadd.f32 %v1105_v53, %v1104_v40 }
 0x5b8   : > { %v1381_v60 = vsel %vm694_vm3, %v1379_v58, 0.0 }
 0x5b9   : > { %v1042_v23 = vpop.permute.xlu1 %1041 }
 0x5ba   : > { %v1049_v34 = vmul.f32 %v1042_v23, %v2998_v16 }
 0x5bc   : > { %v1051_v21 = vsel %vm694_vm3, %v1049_v34, 0.0  ;;  %v1287_v34 = vsel %vm694_vm3, %v1285_v36, 0.0 }
 0x5bd   : > { %v1053_v30 = vadd.f32 %v1052_v29, %v1051_v21 }
 0x5be   : > { %v1137_v31 = vpop.permute.xlu1 %1136 }
 0x5bf   : > { %v1054_v19 = vrot.slane %v1053_v30, 4  ;;  %v1143_v56 = vmul.f32 %v1137_v31, %v1133_v32  ;;  %v1333_v32 = vsel %vm694_vm3, %v1331_v2, 0.0 }
 0x5c0   : > { %v1335_v12 = vadd.f32 %v1334_v43, %v1333_v32  ;;  %v1416_v43 = vmul.f32 0.5, %v2805_v22 }
 0x5c1   : > { %v1055_v41 = vadd.f32 %v1054_v19, %v1053_v30  ;;  %v1145_v16 = vsel %vm694_vm3, %v1143_v56, 0.0 }
 0x5c2   : > { %v1147_v61 = vadd.f32 %v1146_v38, %v1145_v16  ;;  %v1336_v8 = vrot.slane %v1335_v12, 4  ;;  %2003 = vtanh.f32 %v1416_v43 }
 0x5c3   : > { %v1056_v50 = vrot.slane %v1055_v41, 2  ;;  %v1184_v51 = vpop.permute.xlu1 %1183 }
 0x5c4   : > { %v1148_v13 = vrot.slane %v1147_v61, 4  ;;  %v1190_v55 = vmul.f32 %v1184_v51, %v1180_v46  ;;  %v1337_v20 = vadd.f32 %v1336_v8, %v1335_v12 }
 0x5c5   : > { %v1057_v48 = vadd.f32 %v1056_v50, %v1055_v41 }
 0x5c6   : > { %v1149_v59 = vadd.f32 %v1148_v13, %v1147_v61  ;;  %v1192_v24 = vsel %vm694_vm3, %v1190_v55, 0.0  ;;  %v1338_v30 = vrot.slane %v1337_v20, 2 }
 0x5c7   : > { %v1058_v37 = vrot.slane %v1057_v48, 1  ;;  %v1194_v63 = vadd.f32 %v1193_v9, %v1192_v24 }
 0x5c8   : > { %v1150_v0 = vrot.slane %v1149_v59, 2  ;;  %v1231_v3 = vpop.permute.xlu1 %1230  ;;  %v1339_v16 = vadd.f32 %v1338_v30, %v1337_v20 }
 0x5c9   : > { %v1059_v4 = vadd.f32 %v1058_v37, %v1057_v48  ;;  %v1195_v7 = vrot.slane %v1194_v63, 4  ;;  %v1237_v46 = vmul.f32 %v1231_v3, %v3015_v54  ;;  %v1693_v3 = vld [vmem:[#allocation18] ss:$0 sm:$0xff] }
 0x5ca   : > { %v1151_v10 = vadd.f32 %v1150_v0, %v1149_v59  ;;  %v1340_v55 = vrot.slane %v1339_v16, 1 }
 0x5cb   : > { %v1389_v6 = vsel %vm813_vm4, %v1059_v4, %v1106_v33  ;;  %v1196_v14 = vadd.f32 %v1195_v7, %v1194_v63  ;;  %v1239_v15 = vsel %vm694_vm3, %v1237_v46, 0.0  ;;  %v1414_v4 = vmul.f32 %v1693_v3, %v2887_v44 }
 0x5cc   : > { %v1152_v47 = vrot.slane %v1151_v10, 1  ;;  %v1241_v57 = vadd.f32 %v1240_v42, %v1239_v15  ;;  %v1341_v12 = vadd.f32 %v1340_v55, %v1339_v16  ;;  %v2004_v0 = vpop.eup %2003 }
 0x5cd   : > { %v1197_v62 = vrot.slane %v1196_v14, 2  ;;  %v1278_v17 = vpop.permute.xlu1 %1277  ;;  %v1418_v33 = vadd.f32 1.0, %v2004_v0 }
 0x5ce   : > { %v1153_v49 = vadd.f32 %v1152_v47, %v1151_v10  ;;  %v1242_v54 = vrot.slane %v1241_v57, 4  ;;  %v1284_v52 = vmul.f32 %v1278_v17, %v3019_v25 }
 0x5cf   : > { %v1198_v23 = vadd.f32 %v1197_v62, %v1196_v14  ;;  %v1419_v46 = vmul.f32 %v1418_v33, %v1416_v43 }
 0x5d0   : > { %v1391_v27 = vsel %vm1390_vm7, %v1389_v6, %v1153_v49  ;;  %v1243_v29 = vadd.f32 %v1242_v54, %v1241_v57  ;;  %v1286_v21 = vsel %vm694_vm3, %v1284_v52, 0.0 }
 0x5d1   : > { %v1199_v45 = vrot.slane %v1198_v23, 1  ;;  %v1288_v28 = vadd.f32 %v1287_v34, %v1286_v21 }
 0x5d2   : > { %v1244_v31 = vrot.slane %v1243_v29, 2  ;;  %v1372_v35 = vpop.permute.xlu1 %1371 }
 0x5d3   : > { %v1200_v19 = vadd.f32 %v1199_v45, %v1198_v23  ;;  %v1289_v56 = vrot.slane %v1288_v28, 4  ;;  %v1378_v38 = vmul.f32 %v1372_v35, %v3023_v11 }
 0x5d4   : > { %v1245_v25 = vadd.f32 %v1244_v31, %v1243_v29 }
 0x5d5   : > { %v1393_v2 = vsel %vm1392_vm8, %v1391_v27, %v1200_v19  ;;  %v1290_v40 = vadd.f32 %v1289_v56, %v1288_v28  ;;  %v1380_v41 = vsel %vm694_vm3, %v1378_v38, 0.0 }
 0x5d6   : > { %v1246_v26 = vrot.slane %v1245_v25, 1  ;;  %v1382_v18 = vadd.f32 %v1381_v60, %v1380_v41 }
 0x5d7   : > { %v1291_v61 = vrot.slane %v1290_v40, 2 }
 0x5d8   : > { %v1247_v50 = vadd.f32 %v1246_v26, %v1245_v25  ;;  %v1383_v51 = vrot.slane %v1382_v18, 4 }
 0x5d9   : > { %v1292_v13 = vadd.f32 %v1291_v61, %v1290_v40 }
 0x5da   : > { %v1395_v53 = vsel %vm1394_vm9, %v1393_v2, %v1247_v50  ;;  %v1384_v11 = vadd.f32 %v1383_v51, %v1382_v18 }
 0x5db   : > { %v1293_v32 = vrot.slane %v1292_v13, 1 }
 0x5dc   : > { %v1385_v48 = vrot.slane %v1384_v11, 2 }
 0x5dd   : > { %v1294_v9 = vadd.f32 %v1293_v32, %v1292_v13 }
 0x5de   : > { %v1386_v59 = vadd.f32 %v1385_v48, %v1384_v11 }
 0x5df   : > { %v1397_v24 = vsel %vm1396_vm10, %v1395_v53, %v1294_v9 }
 0x5e0   : > { %v1399_v39 = vsel %vm1398_vm11, %v1397_v24, %v1341_v12  ;;  %v1387_v37 = vrot.slane %v1386_v59, 1 }
 0x5e2   : > { %v1388_v22 = vadd.f32 %v1387_v37, %v1386_v59 }
 0x5e4   : > { %v1401_v63 = vsel %vm1400_vm12, %v1399_v39, %v1388_v22 }
 0x5e5   : > { %1402 = vst.msk [vmem:[#allocation4] sm:$0xff] %vm694_vm3, %v1401_v63 }
 0x5ec   : > { %v1405_v7 = vld [vmem:[#allocation4] sm:$0xff] }
 0x5ed   : > { %v1415_v8 = vadd.f32 %v1414_v4, %v1405_v7 }
 0x5ef   : > { %v1420_v10 = vmul.f32 %v1419_v46, %v1415_v8 }
 0x5f1   : > { %v1421_v42 = vpack.c.bf16 %v1420_v10, %v1420_v10 }
 0x5f3   : > { %1757 = vmatmul.mubr.msk.bf16.vlgmr.msra.gmra.mrb[8].mxu0 %vm694_vm3, %v1421_v42 }
 0x6c6   : > { %v1476_v6 = vpop.f32.mrb[8].mxu0 }
 0x6c7   : > { %v1477_v14 = vadd.f32 %v1476_v6, %v2766_v1  ;;  %v1758_v15 = vpop.f32.mrb[9].mxu0 }
 0x6c8   : > { %v1479_v44 = vpop.f32.mrb[10].mxu0 }
 0x6c9   : > { %1482 = vst.msk [vmem:[%s2763_s3] sm:$0xff] %vm577_vm1, %v1477_v14  ;;  %v1759_v36 = vpop.f32.mrb[11].mxu0 }
 0x6ca   : > { %2244 = shalt.err (!%p2241_p5)
}
 0x6cb   : > { %s2245_s22 = scalar_lea.hbm %s3067_s10, 128  ;;  %s2249_s20 = scalar_lea.hbm %s3188_s2, 512 }
 0x6cc   : > { %p2246_p11 = scmp.ne.s32.totalorder %s3067_s10, %s2245_s22  ;;  %p2250_p12 = scmp.lt.u32.totalorder %s3067_s10, %s3188_s2 }
 0x6cd   : > { %p2251_p6 = scmp.lt.u32.totalorder %s2249_s20, %s2245_s22  ;;  %p2253_p8 = scmp.lt.u32.totalorder %s2245_s22, %s3067_s10 }
 0x6ce   : > { %p2247_p13 = pnand %p2246_p11, %p3189_p7 }
 0x6cf   : > { %p2252_p4 = por %p2251_p6, %p2250_p12 }
 0x6d0   : > { %p2248_p0 = pneg %p2247_p13 }
 0x6d1   : > { %p2254_p3 = por %p2253_p8, %p2252_p4 }
 0x6d3   : > { %p2255_p2 = pnand %p2254_p3, %p2248_p0 }
 0x6d5   : > { %2258 = shalt.err (!%p2255_p2)
}
 0x6d6   : > { %1790 = dma.vmem_to_hbm [thread:$0]  (%p3189_p7), %s3069_s18, 128, %s3067_s10, %s1484_s1  }
 0x6d7 PF: > { %p1837_p9 = scmp.ge.s32.totalorder %s2345_s15, 2  ;;  %s1511_s4 = sand.u32 1, %s2317_s25  }
 0x6d8   : > { %p3190_p10 = scmp.ne.s32.totalorder %s3175_s24, 0  ;;  %s1512_s5 = scalar_lea.sflag [#allocation8], %s1511_s4 }
 0x6da   : > { %p1819_p1 = pnand %p1837_p9, %p3190_p10 }
 0x6dc   : > { %2312 = dma.done.wait (!%p1819_p1), %s1512_s5, 128  }
 0x6dd   : > { %2314 = vsyncadd (!%p1819_p1), %s1512_s5, 4294967168  ;;  %s33_s15 = sadd.s32 1, %s2345_s15   ;;  %s3191_s25 = smov %s2321_s26 }
 0x6de   : > { %p30_p5 = scmp.ge.s32.totalorder %s33_s15, 6   ;;  %s3192_s26 = smov %s2325_s27 }
 0x6df   : > { %s3193_s27 = smov %s2694_s28  ;;  %s3194_s28 = smov %s2337_s30 }
 0x6e0   : > { %s3195_s29 = smov %s2341_s14  ;;  %s3196_s30 = smov %s3199_s16 }
 0x6e1   : > { %s3197_s14 = smov %s3203_s21  ;;  %32 = sbr.rel (!%p30_p5) target bundleno = 23 (0x17), region = 150 }
 0x6e8   :  { %1517 = vsyncpa [#allocation7], 1 }
 0x6e9   :  { %1519 = vsyncpa [#allocation7 + $0x1], 1 }
 0x6ea   :  { %1520 = vsyncpa [#allocation10], 1 }
 0x6eb   :  { %1521 = vsyncpa [#allocation13], 1 }
 0x6ec   :  { %1522 = vsyncpa [#allocation16], 1 }
 0x6ed   :  { %1523 = vsyncpa [#allocation19], 1 }
 0x6ee   :  { %1524 = vsyncpa [#allocation8], 1 }
 0x6ef   :  { %1526 = vsyncpa [#allocation8 + $0x1], 1 }

</bundles_post_ra>
